<compile_context>
chip_gen: v6e
topology: v6e:2x2x1
jax: 0.10.0
libtpu: 0.0.40
codegen_flags: <defaults>
</compile_context>

<pallas_src>
import functools

import jax
import jax.numpy as jnp
from jax import lax
from jax.experimental import pallas as pl
from jax.experimental.pallas import tpu as pltpu

PADDING_INDEX = 0

_MAX_CHUNK_T = 32  # cap the fully-static inner time loop (kernel code size bound)


def _round_up(x, m):
    return ((x + m - 1) // m) * m


def _pad_gate_cols(w, h, hp):
    """(..., 3*h) -> (..., 3*hp): each (r, z, n) gate block zero-padded to hp lanes."""
    if hp == h:
        return w
    pad = [(0, 0)] * (w.ndim - 1) + [(0, hp - h)]
    return jnp.concatenate(
        [jnp.pad(w[..., g * h:(g + 1) * h], pad) for g in range(3)], axis=-1)


def _choose_chunk_t(T, B, Hp, vmem_budget_bytes=4 * 1024 * 1024):
    """Largest chunk length (timesteps) that divides T, keeps chunk rows sublane
    aligned, and keeps the double-buffered chunk tiles within the VMEM budget."""
    per_t = 2 * 2 * B * (3 * Hp * 4 + Hp * 2)  # both dirs, 2 buffers, gi f32 + out bf16
    cap = max(1, min(_MAX_CHUNK_T, vmem_budget_bytes // max(per_t, 1)))
    valid = [c for c in range(1, T + 1)
             if T % c == 0 and ((c * B) % 8 == 0 or c == T)]
    within = [c for c in valid if c <= cap]
    if within:
        return max(within)
    return min(valid)  # smallest legal chunk (possibly the whole sequence)


def _vmem_limit_bytes(rows, B, Hp):
    chunk = rows * (3 * Hp * 4 + Hp * 2)                  # gi f32 + out bf16, per dir
    fixed = Hp * 3 * Hp * 2 + 8 * Hp * 4 + B * Hp * 4     # W_hh bf16 + bias + h_n
    scratch = 2 * B * Hp * 4
    est = 2 * 2 * (chunk + fixed) + scratch               # x2 dirs, x2 double-buffer
    return int(min(64 * 1024 * 1024, max(16 * 1024 * 1024, 2 * est)))


# ----------------------------------------------------------------------------
# Pallas kernel: one bidirectional GRU layer.  The grid runs over T-chunks; the
# hidden states are carried across grid steps in VMEM scratch.
# ----------------------------------------------------------------------------
def _bigru_layer_kernel(gi_f_ref, gi_b_ref, whh_f_ref, whh_b_ref,
                        bhn_f_ref, bhn_b_ref,
                        out_f_ref, out_b_ref, hn_f_ref, hn_b_ref,
                        h_f_scr, h_b_scr, *, B):
    """gi_*  : (chunk_t*B, 3*Hp) f32  precomputed x@W_ih + b_ih (+ b_hh for r,z)
       whh_* : (Hp, 3*Hp)       bf16  recurrent weights (MXU operands)
       bhn_* : (1, Hp)          f32   n-gate b_hh (applied inside r*(...))
       out_* : (chunk_t*B, Hp)  bf16  per-direction hidden sequence (time order)
       hn_*  : (B, Hp)          f32   final per-direction hidden (resident output)
       h_*_scr: (B, Hp)         f32   hidden state carried across chunks."""
    rows, three_hp = gi_f_ref.shape
    Hp = three_hp // 3
    C = rows // B  # timesteps in this chunk (static)

    @pl.when(pl.program_id(0) == 0)
    def _init():
        h_f_scr[...] = jnp.zeros_like(h_f_scr)
        h_b_scr[...] = jnp.zeros_like(h_b_scr)

    # Hoist loop-invariant reads and their (B, Hp) broadcast out of the time loop.
    bhn_f = jnp.broadcast_to(bhn_f_ref[...], (B, Hp))
    bhn_b = jnp.broadcast_to(bhn_b_ref[...], (B, Hp))

    def cell(gi, h_prev, whh_ref, bhn):
        # Only the h-recurrence runs here; gi already contains the x projection.
        gh = jnp.dot(h_prev.astype(whh_ref.dtype), whh_ref[...],
                     preferred_element_type=jnp.float32)
        r = jax.nn.sigmoid(gi[:, 0 * Hp:1 * Hp] + gh[:, 0 * Hp:1 * Hp])
        z = jax.nn.sigmoid(gi[:, 1 * Hp:2 * Hp] + gh[:, 1 * Hp:2 * Hp])
        n = jnp.tanh(gi[:, 2 * Hp:3 * Hp] + r * (gh[:, 2 * Hp:3 * Hp] + bhn))
        return (1.0 - z) * n + z * h_prev

    h_f = h_f_scr[...]
    h_b = h_b_scr[...]
    # Static Python loop => static sub-tile slices on the sublane-dense 2-D layout,
    # and both independent direction chains interleave inside each iteration.
    for t in range(C):
        h_f = cell(gi_f_ref[t * B:(t + 1) * B, :], h_f, whh_f_ref, bhn_f)
        out_f_ref[t * B:(t + 1) * B, :] = h_f.astype(out_f_ref.dtype)
        tb = C - 1 - t  # backward chunks arrive in reverse time order (index_map)
        h_b = cell(gi_b_ref[tb * B:(tb + 1) * B, :], h_b, whh_b_ref, bhn_b)
        out_b_ref[tb * B:(tb + 1) * B, :] = h_b.astype(out_b_ref.dtype)

    h_f_scr[...] = h_f
    h_b_scr[...] = h_b
    # Resident outputs: the value written on the last grid step is the final hidden
    # state (fwd after t=T-1, bwd after t=0), flushed to HBM once at the end.
    hn_f_ref[...] = h_f
    hn_b_ref[...] = h_b


def _bigru_layer(gi_f, gi_b, whh_f, whh_b, bhn_f, bhn_b, *,
                 T, B, Hp, chunk_t, out_dtype=jnp.bfloat16):
    assert T % chunk_t == 0
    n_chunks = T // chunk_t
    rows = chunk_t * B
    assert rows % 8 == 0 or rows == T * B, (
        "chunk rows must be sublane aligned or cover the whole sequence")

    kernel = functools.partial(_bigru_layer_kernel, B=B)

    gi_f_spec = pl.BlockSpec((rows, 3 * Hp), lambda i: (i, 0))
    gi_b_spec = pl.BlockSpec((rows, 3 * Hp), lambda i: (n_chunks - 1 - i, 0))
    w_spec = pl.BlockSpec((Hp, 3 * Hp), lambda i: (0, 0))
    b_spec = pl.BlockSpec((1, Hp), lambda i: (0, 0))
    out_f_spec = pl.BlockSpec((rows, Hp), lambda i: (i, 0))
    out_b_spec = pl.BlockSpec((rows, Hp), lambda i: (n_chunks - 1 - i, 0))
    hn_spec = pl.BlockSpec((B, Hp), lambda i: (0, 0))

    return pl.pallas_call(
        kernel,
        out_shape=(jax.ShapeDtypeStruct((T * B, Hp), out_dtype),
                   jax.ShapeDtypeStruct((T * B, Hp), out_dtype),
                   jax.ShapeDtypeStruct((B, Hp), jnp.float32),
                   jax.ShapeDtypeStruct((B, Hp), jnp.float32)),
        grid_spec=pltpu.PrefetchScalarGridSpec(
            num_scalar_prefetch=0,
            grid=(n_chunks,),
            in_specs=[gi_f_spec, gi_b_spec, w_spec, w_spec, b_spec, b_spec],
            out_specs=(out_f_spec, out_b_spec, hn_spec, hn_spec),
            scratch_shapes=[pltpu.VMEM((B, Hp), jnp.float32),
                            pltpu.VMEM((B, Hp), jnp.float32)]),
        compiler_params=pltpu.CompilerParams(
            dimension_semantics=("arbitrary",),       # sequential carry across chunks
            vmem_limit_bytes=_vmem_limit_bytes(rows, B, Hp)),
    )(gi_f, gi_b, whh_f, whh_b, bhn_f, bhn_b)


# ----------------------------------------------------------------------------
# Per-direction parameter preparation (lane-padded, bias folding).
# ----------------------------------------------------------------------------
def _prep_recurrent(p, H, Hp, mxu_dtype):
    w_hh = jnp.pad(_pad_gate_cols(p["w_hh"], H, Hp), ((0, Hp - H), (0, 0)))
    # Fold b_ih and the r/z parts of b_hh into the hoisted projection; the n-gate
    # part of b_hh stays inside the cell (it is multiplied by r).
    b_hh_rz = jnp.concatenate(
        [p["b_hh"][:, :2 * H], jnp.zeros((1, H), p["b_hh"].dtype)], axis=-1)
    b_gi = _pad_gate_cols(p["b_ih"] + b_hh_rz, H, Hp)            # (1, 3Hp) f32
    b_hn = jnp.pad(p["b_hh"][:, 2 * H:], ((0, 0), (0, Hp - H)))  # (1, Hp)  f32
    return w_hh.astype(mxu_dtype), b_gi, b_hn


def _prep_input_weights(p, layer, H, Hp):
    """Input-projection weight parts.  For layer > 0 the weight is split into the
    forward / backward feature blocks and row-padded to Hp, so the previous layer's
    Hp-padded outputs feed in directly (no slice + concat materialized)."""
    w = p["w_ih"]
    if layer == 0:
        return [_pad_gate_cols(w, H, Hp)]                         # (E, 3Hp)
    top = jnp.pad(_pad_gate_cols(w[:H], H, Hp), ((0, Hp - H), (0, 0)))
    bot = jnp.pad(_pad_gate_cols(w[H:], H, Hp), ((0, Hp - H), (0, 0)))
    return [top, bot]                                             # 2 x (Hp, 3Hp)


def _input_projection(parts, weights, b_gi, mxu_dtype):
    """Hoisted time-batched x@W_ih for ALL timesteps (bf16 MXU operands, f32 accum)."""
    acc = None
    for xp, wp in zip(parts, weights):
        term = jnp.dot(xp.astype(mxu_dtype), wp.astype(mxu_dtype),
                       preferred_element_type=jnp.float32)
        acc = term if acc is None else acc + term
    return acc + b_gi


# ----------------------------------------------------------------------------
# SeqEncoder forward (embedding + bidirectional multi-layer GRU).
# ----------------------------------------------------------------------------
def seq_encoder_forward(input_ids, params, *, n_layers, bidirectional=True,
                        mxu_dtype=jnp.bfloat16, chunk_timesteps=None):
    """input_ids: (T, B) int32.  Returns (output, hidden) matching nn.GRU semantics:
       output: (T, B, num_dirs * H)   hidden: (n_layers, B, num_dirs * H)."""
    assert bidirectional, "only the (default) bidirectional path is implemented"

    emb = params["embedding"]                                   # (vocab, emb_dim)
    x = jnp.take(emb, input_ids, axis=0)                        # embedding gather (XLA glue)
    T, B, E = x.shape

    H = params["rnn"][(0, 0)]["w_hh"].shape[0]
    Hp = _round_up(H, 128)  # lane-pad each gate block to a full vreg lane width
    if chunk_timesteps is None:
        chunk_t = _choose_chunk_t(T, B, Hp)
    else:
        chunk_t = int(chunk_timesteps)
        assert T % chunk_t == 0
        assert (chunk_t * B) % 8 == 0 or chunk_t == T

    # Layer input kept 2-D (T*B, feat), bf16, Hp-padded between layers.
    parts = [x.reshape(T * B, E).astype(mxu_dtype)]
    h_final = []

    for layer in range(n_layers):
        p_f = params["rnn"][(layer, 0)]
        p_b = params["rnn"][(layer, 1)]
        assert p_f["w_hh"].shape[0] == H

        whh_f, bgi_f, bhn_f = _prep_recurrent(p_f, H, Hp, mxu_dtype)
        whh_b, bgi_b, bhn_b = _prep_recurrent(p_b, H, Hp, mxu_dtype)
        wih_f = _prep_input_weights(p_f, layer, H, Hp)
        wih_b = _prep_input_weights(p_b, layer, H, Hp)

        gi_f = _input_projection(parts, wih_f, bgi_f, mxu_dtype)   # (T*B, 3Hp) f32
        gi_b = _input_projection(parts, wih_b, bgi_b, mxu_dtype)

        out_f, out_b, hn_f, hn_b = _bigru_layer(
            gi_f, gi_b, whh_f, whh_b, bhn_f, bhn_b,
            T=T, B=B, Hp=Hp, chunk_t=chunk_t)

        h_final.append((hn_f[:, :H], hn_b[:, :H]))
        parts = [out_f, out_b]  # Hp-padded bf16 outputs; fed to next layer as-is

    # Slice real lanes / restore (T, B, 2H) only once, at the very end.
    output = jnp.concatenate([parts[0][:, :H], parts[1][:, :H]], axis=-1)
    output = output.reshape(T, B, 2 * H).astype(jnp.float32)

    # nn.GRU h_n layout + _reshape_encoder_hidden == per-layer concat(fwd, bwd).
    hidden = jnp.stack(
        [jnp.concatenate([hf, hb], axis=-1) for hf, hb in h_final], axis=0)
    return output, hidden


# ----------------------------------------------------------------------------
# Pure-JAX f32 reference (mirrors nn.Embedding + bidirectional nn.GRU).
# ----------------------------------------------------------------------------
def _ref_gru_cell(p, x_t, h):
    H = h.shape[-1]
    gi = x_t @ p["w_ih"] + p["b_ih"]
    gh = h @ p["w_hh"] + p["b_hh"]
    r = jax.nn.sigmoid(gi[:, :H] + gh[:, :H])
    z = jax.nn.sigmoid(gi[:, H:2 * H] + gh[:, H:2 * H])
    n = jnp.tanh(gi[:, 2 * H:] + r * gh[:, 2 * H:])
    return (1.0 - z) * n + z * h


def seq_encoder_reference(input_ids, params, *, n_layers):
    x = jnp.take(params["embedding"], input_ids, axis=0)
    T, B, _ = x.shape
    h_n = []
    for layer in range(n_layers):
        outs = []
        for d in range(2):
            p = params["rnn"][(layer, d)]
            H = p["w_hh"].shape[0]
            xs = x if d == 0 else x[::-1]

            def step(h, x_t, p=p):
                h2 = _ref_gru_cell(p, x_t, h)
                return h2, h2

            h_last, seq = lax.scan(step, jnp.zeros((B, H), jnp.float32), xs)
            outs.append(seq if d == 0 else seq[::-1])
            h_n.append(h_last)
        x = jnp.concatenate(outs, axis=-1)
    hidden = jnp.stack(h_n, axis=0)
    hidden = jnp.concatenate([hidden[0::2], hidden[1::2]], axis=2)
    return x, hidden


# ----------------------------------------------------------------------------
# Deterministic parameter construction (shapes match nn.Embedding + nn.GRU).
# ----------------------------------------------------------------------------
def init_params(key, *, vocab_size, embedding_size, rnn_size, n_layers, bidirectional):
    H = rnn_size // 2 if bidirectional else rnn_size
    dirs = 2 if bidirectional else 1
    keys = jax.random.split(key, 1 + 4 * n_layers * dirs)

    emb = 0.1 * jax.random.normal(keys[0], (vocab_size, embedding_size), jnp.float32)
    emb = emb.at[PADDING_INDEX].set(0.0)  # padding_idx row is zero

    rnn = {}
    k = 1
    for layer in range(n_layers):
        in_dim = embedding_size if layer == 0 else H * dirs
        for d in range(dirs):
            rnn[(layer, d)] = {
                # stored pre-transposed: (in_dim, 3H) / (H, 3H), gate order r, z, n
                "w_ih": 0.1 * jax.random.normal(keys[k + 0], (in_dim, 3 * H), jnp.float32),
                "w_hh": 0.1 * jax.random.normal(keys[k + 1], (H, 3 * H), jnp.float32),
                "b_ih": 0.1 * jax.random.normal(keys[k + 2], (1, 3 * H), jnp.float32),
                "b_hh": 0.1 * jax.random.normal(keys[k + 3], (1, 3 * H), jnp.float32),
            }
            k += 4
    return {"embedding": emb, "rnn": rnn}


if __name__ == "__main__":
    # Small config consistent with the module.  NOTE: throughput of the recurrent
    # matmul scales ~linearly with batch; callers should batch sequences when possible.
    vocab_size = 50
    embedding_size = 32
    rnn_size = 32          # bidirectional -> per-direction hidden = 16
    n_layers = 2
    bidirectional = True
    seq_len, batch = 8, 2

    key = jax.random.PRNGKey(0)
    pkey, ikey = jax.random.split(key)
    params = init_params(
        pkey,
        vocab_size=vocab_size,
        embedding_size=embedding_size,
        rnn_size=rnn_size,
        n_layers=n_layers,
        bidirectional=bidirectional,
    )
    input_ids = jax.random.randint(ikey, (seq_len, batch), 0, vocab_size, dtype=jnp.int32)

    fwd = jax.jit(functools.partial(
        seq_encoder_forward, n_layers=n_layers, bidirectional=bidirectional,
        chunk_timesteps=4))  # 2 T-chunks -> exercises the chunked-grid carry path
    output, hidden = fwd(input_ids, params)
    jax.block_until_ready((output, hidden))

    assert output.shape == (seq_len, batch, rnn_size), output.shape
    assert hidden.shape == (n_layers, batch, rnn_size), hidden.shape
    assert bool(jnp.all(jnp.isfinite(output))) and bool(jnp.all(jnp.isfinite(hidden)))

    # Tolerance check vs. the pure-JAX f32 reference (bf16 MXU operands + bf16
    # inter-layer activations => small, bounded deviation).
    ref_out, ref_hid = jax.jit(functools.partial(
        seq_encoder_reference, n_layers=n_layers))(input_ids, params)
    out_err = float(jnp.max(jnp.abs(output - ref_out)))
    hid_err = float(jnp.max(jnp.abs(hidden - ref_hid)))
    assert out_err < 2e-2 and hid_err < 2e-2, (out_err, hid_err)

    print("KERNEL_OK")
</pallas_src>

<mosaic_0001>
module attributes {stable_mosaic.version = 11 : i64} {
  func.func @_bigru_layer_kernel(%arg0: i32, %arg1: memref<8x384xf32, #tpu.memory_space<vmem>>, %arg2: memref<8x384xf32, #tpu.memory_space<vmem>>, %arg3: memref<128x384xbf16, #tpu.memory_space<vmem>>, %arg4: memref<128x384xbf16, #tpu.memory_space<vmem>>, %arg5: memref<1x128xf32, #tpu.memory_space<vmem>>, %arg6: memref<1x128xf32, #tpu.memory_space<vmem>>, %arg7: memref<8x128xbf16, #tpu.memory_space<vmem>>, %arg8: memref<8x128xbf16, #tpu.memory_space<vmem>>, %arg9: memref<2x128xf32, #tpu.memory_space<vmem>>, %arg10: memref<2x128xf32, #tpu.memory_space<vmem>>, %arg11: memref<2x128xf32, #tpu.memory_space<vmem>>, %arg12: memref<2x128xf32, #tpu.memory_space<vmem>>) attributes {dimension_semantics = [#tpu.dimension_semantics<arbitrary>], iteration_bounds = array<i64: 2>, scalar_prefetch = 0 : i64, scratch_operands = 2 : i64, tpu.core_type = #tpu.core_type<tc>, window_params = [{transform_indices = @transform_0, window_bounds = array<i64: 8, 384>}, {transform_indices = @transform_1, window_bounds = array<i64: 8, 384>}, {pipeline_mode = #tpu.pipeline_mode<synchronous>, transform_indices = @transform_2, window_bounds = array<i64: 128, 384>}, {pipeline_mode = #tpu.pipeline_mode<synchronous>, transform_indices = @transform_3, window_bounds = array<i64: 128, 384>}, {pipeline_mode = #tpu.pipeline_mode<synchronous>, transform_indices = @transform_4, window_bounds = array<i64: 1, 128>}, {pipeline_mode = #tpu.pipeline_mode<synchronous>, transform_indices = @transform_5, window_bounds = array<i64: 1, 128>}, {transform_indices = @transform_6, window_bounds = array<i64: 8, 128>}, {transform_indices = @transform_7, window_bounds = array<i64: 8, 128>}, {pipeline_mode = #tpu.pipeline_mode<synchronous>, transform_indices = @transform_8, window_bounds = array<i64: 2, 128>}, {pipeline_mode = #tpu.pipeline_mode<synchronous>, transform_indices = @transform_9, window_bounds = array<i64: 2, 128>}]} {
    %c0_i32 = arith.constant 0 : i32
    %0 = arith.cmpi eq, %arg0, %c0_i32 : i32
    %1 = arith.extui %0 : i1 to i32
    %c0_i32_0 = arith.constant 0 : i32
    %2 = arith.cmpi ne, %1, %c0_i32_0 : i32
    scf.if %2 {
      %cst_92 = arith.constant 0.000000e+00 : f32
      %279 = vector.broadcast %cst_92 : f32 to vector<2x128xf32>
      %c0_93 = arith.constant 0 : index
      %c0_94 = arith.constant 0 : index
      %280 = vector.load %arg11[%c0_93, %c0_94] : memref<2x128xf32, #tpu.memory_space<vmem>>, vector<2x128xf32>
      tpu.vector_store %arg11[%c0_93, %c0_94], %279 {strides = array<i32>} : memref<2x128xf32, #tpu.memory_space<vmem>>, vector<2x128xf32>,
      %cst_95 = arith.constant 0.000000e+00 : f32
      %281 = vector.broadcast %cst_95 : f32 to vector<2x128xf32>
      %c0_96 = arith.constant 0 : index
      %c0_97 = arith.constant 0 : index
      %282 = vector.load %arg12[%c0_96, %c0_97] : memref<2x128xf32, #tpu.memory_space<vmem>>, vector<2x128xf32>
      tpu.vector_store %arg12[%c0_96, %c0_97], %281 {strides = array<i32>} : memref<2x128xf32, #tpu.memory_space<vmem>>, vector<2x128xf32>,
    } else {
    }
    %c0 = arith.constant 0 : index
    %c0_1 = arith.constant 0 : index
    %3 = vector.load %arg5[%c0, %c0_1] : memref<1x128xf32, #tpu.memory_space<vmem>>, vector<1x128xf32>
    %4 = vector.shape_cast %3 : vector<1x128xf32> to vector<1x128xf32>
    %5 = vector.broadcast %4 : vector<1x128xf32> to vector<2x128xf32>
    %c0_2 = arith.constant 0 : index
    %c0_3 = arith.constant 0 : index
    %6 = vector.load %arg6[%c0_2, %c0_3] : memref<1x128xf32, #tpu.memory_space<vmem>>, vector<1x128xf32>
    %7 = vector.shape_cast %6 : vector<1x128xf32> to vector<1x128xf32>
    %8 = vector.broadcast %7 : vector<1x128xf32> to vector<2x128xf32>
    %c0_4 = arith.constant 0 : index
    %c0_5 = arith.constant 0 : index
    %9 = vector.load %arg11[%c0_4, %c0_5] : memref<2x128xf32, #tpu.memory_space<vmem>>, vector<2x128xf32>
    %c0_6 = arith.constant 0 : index
    %c0_7 = arith.constant 0 : index
    %10 = vector.load %arg12[%c0_6, %c0_7] : memref<2x128xf32, #tpu.memory_space<vmem>>, vector<2x128xf32>
    %c0_8 = arith.constant 0 : index
    %c0_9 = arith.constant 0 : index
    %11 = vector.load %arg1[%c0_8, %c0_9] : memref<8x384xf32, #tpu.memory_space<vmem>>, vector<2x384xf32>
    %12 = arith.truncf %9 : vector<2x128xf32> to vector<2x128xbf16>
    %c0_10 = arith.constant 0 : index
    %c0_11 = arith.constant 0 : index
    %13 = vector.load %arg3[%c0_10, %c0_11] : memref<128x384xbf16, #tpu.memory_space<vmem>>, vector<128x384xbf16>
    %cst = arith.constant dense<0.000000e+00> : vector<2x384xf32>
    %14 = tpu.matmul %12, %13, %cst {dimension_numbers = #tpu.dot_dimension_numbers<[1], [0], [0], [1], [0, 0, 1, 1], [], []>} : vector<2x128xbf16>, vector<128x384xbf16>, vector<2x384xf32> -> vector<2x384xf32>
    %15 = vector.extract_strided_slice %11 {offsets = [0, 0], sizes = [2, 128], strides = [1, 1]} : vector<2x384xf32> to vector<2x128xf32>
    %16 = vector.extract_strided_slice %14 {offsets = [0, 0], sizes = [2, 128], strides = [1, 1]} : vector<2x384xf32> to vector<2x128xf32>
    %17 = arith.addf %15, %16 : vector<2x128xf32>
    %18 = arith.negf %17 : vector<2x128xf32>
    %19 = math.exp %18 : vector<2x128xf32>
    %cst_12 = arith.constant 1.000000e+00 : f32
    %20 = vector.broadcast %cst_12 : f32 to vector<2x128xf32>
    %21 = arith.addf %20, %19 : vector<2x128xf32>
    %22 = arith.divf %20, %21 : vector<2x128xf32>
    %23 = vector.extract_strided_slice %11 {offsets = [0, 128], sizes = [2, 128], strides = [1, 1]} : vector<2x384xf32> to vector<2x128xf32>
    %24 = vector.extract_strided_slice %14 {offsets = [0, 128], sizes = [2, 128], strides = [1, 1]} : vector<2x384xf32> to vector<2x128xf32>
    %25 = arith.addf %23, %24 : vector<2x128xf32>
    %26 = arith.negf %25 : vector<2x128xf32>
    %27 = math.exp %26 : vector<2x128xf32>
    %cst_13 = arith.constant 1.000000e+00 : f32
    %28 = vector.broadcast %cst_13 : f32 to vector<2x128xf32>
    %29 = arith.addf %28, %27 : vector<2x128xf32>
    %30 = arith.divf %28, %29 : vector<2x128xf32>
    %31 = vector.extract_strided_slice %11 {offsets = [0, 256], sizes = [2, 128], strides = [1, 1]} : vector<2x384xf32> to vector<2x128xf32>
    %32 = vector.extract_strided_slice %14 {offsets = [0, 256], sizes = [2, 128], strides = [1, 1]} : vector<2x384xf32> to vector<2x128xf32>
    %33 = arith.addf %32, %5 : vector<2x128xf32>
    %34 = arith.mulf %22, %33 : vector<2x128xf32>
    %35 = arith.addf %31, %34 : vector<2x128xf32>
    %36 = math.tanh %35 : vector<2x128xf32>
    %cst_14 = arith.constant 1.000000e+00 : f32
    %37 = vector.broadcast %cst_14 : f32 to vector<2x128xf32>
    %38 = arith.subf %37, %30 : vector<2x128xf32>
    %39 = arith.mulf %38, %36 : vector<2x128xf32>
    %40 = arith.mulf %30, %9 : vector<2x128xf32>
    %41 = arith.addf %39, %40 : vector<2x128xf32>
    %42 = arith.truncf %41 : vector<2x128xf32> to vector<2x128xbf16>
    %c0_15 = arith.constant 0 : index
    %c0_16 = arith.constant 0 : index
    %43 = vector.load %arg7[%c0_15, %c0_16] : memref<8x128xbf16, #tpu.memory_space<vmem>>, vector<2x128xbf16>
    tpu.vector_store %arg7[%c0_15, %c0_16], %42 {strides = array<i32>} : memref<8x128xbf16, #tpu.memory_space<vmem>>, vector<2x128xbf16>,
    %c6 = arith.constant 6 : index
    %c0_17 = arith.constant 0 : index
    %44 = vector.load %arg2[%c6, %c0_17] : memref<8x384xf32, #tpu.memory_space<vmem>>, vector<2x384xf32>
    %45 = arith.truncf %10 : vector<2x128xf32> to vector<2x128xbf16>
    %c0_18 = arith.constant 0 : index
    %c0_19 = arith.constant 0 : index
    %46 = vector.load %arg4[%c0_18, %c0_19] : memref<128x384xbf16, #tpu.memory_space<vmem>>, vector<128x384xbf16>
    %cst_20 = arith.constant dense<0.000000e+00> : vector<2x384xf32>
    %47 = tpu.matmul %45, %46, %cst_20 {dimension_numbers = #tpu.dot_dimension_numbers<[1], [0], [0], [1], [0, 0, 1, 1], [], []>} : vector<2x128xbf16>, vector<128x384xbf16>, vector<2x384xf32> -> vector<2x384xf32>
    %48 = vector.extract_strided_slice %44 {offsets = [0, 0], sizes = [2, 128], strides = [1, 1]} : vector<2x384xf32> to vector<2x128xf32>
    %49 = vector.extract_strided_slice %47 {offsets = [0, 0], sizes = [2, 128], strides = [1, 1]} : vector<2x384xf32> to vector<2x128xf32>
    %50 = arith.addf %48, %49 : vector<2x128xf32>
    %51 = arith.negf %50 : vector<2x128xf32>
    %52 = math.exp %51 : vector<2x128xf32>
    %cst_21 = arith.constant 1.000000e+00 : f32
    %53 = vector.broadcast %cst_21 : f32 to vector<2x128xf32>
    %54 = arith.addf %53, %52 : vector<2x128xf32>
    %55 = arith.divf %53, %54 : vector<2x128xf32>
    %56 = vector.extract_strided_slice %44 {offsets = [0, 128], sizes = [2, 128], strides = [1, 1]} : vector<2x384xf32> to vector<2x128xf32>
    %57 = vector.extract_strided_slice %47 {offsets = [0, 128], sizes = [2, 128], strides = [1, 1]} : vector<2x384xf32> to vector<2x128xf32>
    %58 = arith.addf %56, %57 : vector<2x128xf32>
    %59 = arith.negf %58 : vector<2x128xf32>
    %60 = math.exp %59 : vector<2x128xf32>
    %cst_22 = arith.constant 1.000000e+00 : f32
    %61 = vector.broadcast %cst_22 : f32 to vector<2x128xf32>
    %62 = arith.addf %61, %60 : vector<2x128xf32>
    %63 = arith.divf %61, %62 : vector<2x128xf32>
    %64 = vector.extract_strided_slice %44 {offsets = [0, 256], sizes = [2, 128], strides = [1, 1]} : vector<2x384xf32> to vector<2x128xf32>
    %65 = vector.extract_strided_slice %47 {offsets = [0, 256], sizes = [2, 128], strides = [1, 1]} : vector<2x384xf32> to vector<2x128xf32>
    %66 = arith.addf %65, %8 : vector<2x128xf32>
    %67 = arith.mulf %55, %66 : vector<2x128xf32>
    %68 = arith.addf %64, %67 : vector<2x128xf32>
    %69 = math.tanh %68 : vector<2x128xf32>
    %cst_23 = arith.constant 1.000000e+00 : f32
    %70 = vector.broadcast %cst_23 : f32 to vector<2x128xf32>
    %71 = arith.subf %70, %63 : vector<2x128xf32>
    %72 = arith.mulf %71, %69 : vector<2x128xf32>
    %73 = arith.mulf %63, %10 : vector<2x128xf32>
    %74 = arith.addf %72, %73 : vector<2x128xf32>
    %75 = arith.truncf %74 : vector<2x128xf32> to vector<2x128xbf16>
    %c6_24 = arith.constant 6 : index
    %c0_25 = arith.constant 0 : index
    %76 = vector.load %arg8[%c6_24, %c0_25] : memref<8x128xbf16, #tpu.memory_space<vmem>>, vector<2x128xbf16>
    tpu.vector_store %arg8[%c6_24, %c0_25], %75 {strides = array<i32>} : memref<8x128xbf16, #tpu.memory_space<vmem>>, vector<2x128xbf16>,
    %c2 = arith.constant 2 : index
    %c0_26 = arith.constant 0 : index
    %77 = vector.load %arg1[%c2, %c0_26] : memref<8x384xf32, #tpu.memory_space<vmem>>, vector<2x384xf32>
    %78 = arith.truncf %41 : vector<2x128xf32> to vector<2x128xbf16>
    %c0_27 = arith.constant 0 : index
    %c0_28 = arith.constant 0 : index
    %79 = vector.load %arg3[%c0_27, %c0_28] : memref<128x384xbf16, #tpu.memory_space<vmem>>, vector<128x384xbf16>
    %cst_29 = arith.constant dense<0.000000e+00> : vector<2x384xf32>
    %80 = tpu.matmul %78, %79, %cst_29 {dimension_numbers = #tpu.dot_dimension_numbers<[1], [0], [0], [1], [0, 0, 1, 1], [], []>} : vector<2x128xbf16>, vector<128x384xbf16>, vector<2x384xf32> -> vector<2x384xf32>
    %81 = vector.extract_strided_slice %77 {offsets = [0, 0], sizes = [2, 128], strides = [1, 1]} : vector<2x384xf32> to vector<2x128xf32>
    %82 = vector.extract_strided_slice %80 {offsets = [0, 0], sizes = [2, 128], strides = [1, 1]} : vector<2x384xf32> to vector<2x128xf32>
    %83 = arith.addf %81, %82 : vector<2x128xf32>
    %84 = arith.negf %83 : vector<2x128xf32>
    %85 = math.exp %84 : vector<2x128xf32>
    %cst_30 = arith.constant 1.000000e+00 : f32
    %86 = vector.broadcast %cst_30 : f32 to vector<2x128xf32>
    %87 = arith.addf %86, %85 : vector<2x128xf32>
    %88 = arith.divf %86, %87 : vector<2x128xf32>
    %89 = vector.extract_strided_slice %77 {offsets = [0, 128], sizes = [2, 128], strides = [1, 1]} : vector<2x384xf32> to vector<2x128xf32>
    %90 = vector.extract_strided_slice %80 {offsets = [0, 128], sizes = [2, 128], strides = [1, 1]} : vector<2x384xf32> to vector<2x128xf32>
    %91 = arith.addf %89, %90 : vector<2x128xf32>
    %92 = arith.negf %91 : vector<2x128xf32>
    %93 = math.exp %92 : vector<2x128xf32>
    %cst_31 = arith.constant 1.000000e+00 : f32
    %94 = vector.broadcast %cst_31 : f32 to vector<2x128xf32>
    %95 = arith.addf %94, %93 : vector<2x128xf32>
    %96 = arith.divf %94, %95 : vector<2x128xf32>
    %97 = vector.extract_strided_slice %77 {offsets = [0, 256], sizes = [2, 128], strides = [1, 1]} : vector<2x384xf32> to vector<2x128xf32>
    %98 = vector.extract_strided_slice %80 {offsets = [0, 256], sizes = [2, 128], strides = [1, 1]} : vector<2x384xf32> to vector<2x128xf32>
    %99 = arith.addf %98, %5 : vector<2x128xf32>
    %100 = arith.mulf %88, %99 : vector<2x128xf32>
    %101 = arith.addf %97, %100 : vector<2x128xf32>
    %102 = math.tanh %101 : vector<2x128xf32>
    %cst_32 = arith.constant 1.000000e+00 : f32
    %103 = vector.broadcast %cst_32 : f32 to vector<2x128xf32>
    %104 = arith.subf %103, %96 : vector<2x128xf32>
    %105 = arith.mulf %104, %102 : vector<2x128xf32>
    %106 = arith.mulf %96, %41 : vector<2x128xf32>
    %107 = arith.addf %105, %106 : vector<2x128xf32>
    %108 = arith.truncf %107 : vector<2x128xf32> to vector<2x128xbf16>
    %c2_33 = arith.constant 2 : index
    %c0_34 = arith.constant 0 : index
    %109 = vector.load %arg7[%c2_33, %c0_34] : memref<8x128xbf16, #tpu.memory_space<vmem>>, vector<2x128xbf16>
    tpu.vector_store %arg7[%c2_33, %c0_34], %108 {strides = array<i32>} : memref<8x128xbf16, #tpu.memory_space<vmem>>, vector<2x128xbf16>,
    %c4 = arith.constant 4 : index
    %c0_35 = arith.constant 0 : index
    %110 = vector.load %arg2[%c4, %c0_35] : memref<8x384xf32, #tpu.memory_space<vmem>>, vector<2x384xf32>
    %111 = arith.truncf %74 : vector<2x128xf32> to vector<2x128xbf16>
    %c0_36 = arith.constant 0 : index
    %c0_37 = arith.constant 0 : index
    %112 = vector.load %arg4[%c0_36, %c0_37] : memref<128x384xbf16, #tpu.memory_space<vmem>>, vector<128x384xbf16>
    %cst_38 = arith.constant dense<0.000000e+00> : vector<2x384xf32>
    %113 = tpu.matmul %111, %112, %cst_38 {dimension_numbers = #tpu.dot_dimension_numbers<[1], [0], [0], [1], [0, 0, 1, 1], [], []>} : vector<2x128xbf16>, vector<128x384xbf16>, vector<2x384xf32> -> vector<2x384xf32>
    %114 = vector.extract_strided_slice %110 {offsets = [0, 0], sizes = [2, 128], strides = [1, 1]} : vector<2x384xf32> to vector<2x128xf32>
    %115 = vector.extract_strided_slice %113 {offsets = [0, 0], sizes = [2, 128], strides = [1, 1]} : vector<2x384xf32> to vector<2x128xf32>
    %116 = arith.addf %114, %115 : vector<2x128xf32>
    %117 = arith.negf %116 : vector<2x128xf32>
    %118 = math.exp %117 : vector<2x128xf32>
    %cst_39 = arith.constant 1.000000e+00 : f32
    %119 = vector.broadcast %cst_39 : f32 to vector<2x128xf32>
    %120 = arith.addf %119, %118 : vector<2x128xf32>
    %121 = arith.divf %119, %120 : vector<2x128xf32>
    %122 = vector.extract_strided_slice %110 {offsets = [0, 128], sizes = [2, 128], strides = [1, 1]} : vector<2x384xf32> to vector<2x128xf32>
    %123 = vector.extract_strided_slice %113 {offsets = [0, 128], sizes = [2, 128], strides = [1, 1]} : vector<2x384xf32> to vector<2x128xf32>
    %124 = arith.addf %122, %123 : vector<2x128xf32>
    %125 = arith.negf %124 : vector<2x128xf32>
    %126 = math.exp %125 : vector<2x128xf32>
    %cst_40 = arith.constant 1.000000e+00 : f32
    %127 = vector.broadcast %cst_40 : f32 to vector<2x128xf32>
    %128 = arith.addf %127, %126 : vector<2x128xf32>
    %129 = arith.divf %127, %128 : vector<2x128xf32>
    %130 = vector.extract_strided_slice %110 {offsets = [0, 256], sizes = [2, 128], strides = [1, 1]} : vector<2x384xf32> to vector<2x128xf32>
    %131 = vector.extract_strided_slice %113 {offsets = [0, 256], sizes = [2, 128], strides = [1, 1]} : vector<2x384xf32> to vector<2x128xf32>
    %132 = arith.addf %131, %8 : vector<2x128xf32>
    %133 = arith.mulf %121, %132 : vector<2x128xf32>
    %134 = arith.addf %130, %133 : vector<2x128xf32>
    %135 = math.tanh %134 : vector<2x128xf32>
    %cst_41 = arith.constant 1.000000e+00 : f32
    %136 = vector.broadcast %cst_41 : f32 to vector<2x128xf32>
    %137 = arith.subf %136, %129 : vector<2x128xf32>
    %138 = arith.mulf %137, %135 : vector<2x128xf32>
    %139 = arith.mulf %129, %74 : vector<2x128xf32>
    %140 = arith.addf %138, %139 : vector<2x128xf32>
    %141 = arith.truncf %140 : vector<2x128xf32> to vector<2x128xbf16>
    %c4_42 = arith.constant 4 : index
    %c0_43 = arith.constant 0 : index
    %142 = vector.load %arg8[%c4_42, %c0_43] : memref<8x128xbf16, #tpu.memory_space<vmem>>, vector<2x128xbf16>
    tpu.vector_store %arg8[%c4_42, %c0_43], %141 {strides = array<i32>} : memref<8x128xbf16, #tpu.memory_space<vmem>>, vector<2x128xbf16>,
    %c4_44 = arith.constant 4 : index
    %c0_45 = arith.constant 0 : index
    %143 = vector.load %arg1[%c4_44, %c0_45] : memref<8x384xf32, #tpu.memory_space<vmem>>, vector<2x384xf32>
    %144 = arith.truncf %107 : vector<2x128xf32> to vector<2x128xbf16>
    %c0_46 = arith.constant 0 : index
    %c0_47 = arith.constant 0 : index
    %145 = vector.load %arg3[%c0_46, %c0_47] : memref<128x384xbf16, #tpu.memory_space<vmem>>, vector<128x384xbf16>
    %cst_48 = arith.constant dense<0.000000e+00> : vector<2x384xf32>
    %146 = tpu.matmul %144, %145, %cst_48 {dimension_numbers = #tpu.dot_dimension_numbers<[1], [0], [0], [1], [0, 0, 1, 1], [], []>} : vector<2x128xbf16>, vector<128x384xbf16>, vector<2x384xf32> -> vector<2x384xf32>
    %147 = vector.extract_strided_slice %143 {offsets = [0, 0], sizes = [2, 128], strides = [1, 1]} : vector<2x384xf32> to vector<2x128xf32>
    %148 = vector.extract_strided_slice %146 {offsets = [0, 0], sizes = [2, 128], strides = [1, 1]} : vector<2x384xf32> to vector<2x128xf32>
    %149 = arith.addf %147, %148 : vector<2x128xf32>
    %150 = arith.negf %149 : vector<2x128xf32>
    %151 = math.exp %150 : vector<2x128xf32>
    %cst_49 = arith.constant 1.000000e+00 : f32
    %152 = vector.broadcast %cst_49 : f32 to vector<2x128xf32>
    %153 = arith.addf %152, %151 : vector<2x128xf32>
    %154 = arith.divf %152, %153 : vector<2x128xf32>
    %155 = vector.extract_strided_slice %143 {offsets = [0, 128], sizes = [2, 128], strides = [1, 1]} : vector<2x384xf32> to vector<2x128xf32>
    %156 = vector.extract_strided_slice %146 {offsets = [0, 128], sizes = [2, 128], strides = [1, 1]} : vector<2x384xf32> to vector<2x128xf32>
    %157 = arith.addf %155, %156 : vector<2x128xf32>
    %158 = arith.negf %157 : vector<2x128xf32>
    %159 = math.exp %158 : vector<2x128xf32>
    %cst_50 = arith.constant 1.000000e+00 : f32
    %160 = vector.broadcast %cst_50 : f32 to vector<2x128xf32>
    %161 = arith.addf %160, %159 : vector<2x128xf32>
    %162 = arith.divf %160, %161 : vector<2x128xf32>
    %163 = vector.extract_strided_slice %143 {offsets = [0, 256], sizes = [2, 128], strides = [1, 1]} : vector<2x384xf32> to vector<2x128xf32>
    %164 = vector.extract_strided_slice %146 {offsets = [0, 256], sizes = [2, 128], strides = [1, 1]} : vector<2x384xf32> to vector<2x128xf32>
    %165 = arith.addf %164, %5 : vector<2x128xf32>
    %166 = arith.mulf %154, %165 : vector<2x128xf32>
    %167 = arith.addf %163, %166 : vector<2x128xf32>
    %168 = math.tanh %167 : vector<2x128xf32>
    %cst_51 = arith.constant 1.000000e+00 : f32
    %169 = vector.broadcast %cst_51 : f32 to vector<2x128xf32>
    %170 = arith.subf %169, %162 : vector<2x128xf32>
    %171 = arith.mulf %170, %168 : vector<2x128xf32>
    %172 = arith.mulf %162, %107 : vector<2x128xf32>
    %173 = arith.addf %171, %172 : vector<2x128xf32>
    %174 = arith.truncf %173 : vector<2x128xf32> to vector<2x128xbf16>
    %c4_52 = arith.constant 4 : index
    %c0_53 = arith.constant 0 : index
    %175 = vector.load %arg7[%c4_52, %c0_53] : memref<8x128xbf16, #tpu.memory_space<vmem>>, vector<2x128xbf16>
    tpu.vector_store %arg7[%c4_52, %c0_53], %174 {strides = array<i32>} : memref<8x128xbf16, #tpu.memory_space<vmem>>, vector<2x128xbf16>,
    %c2_54 = arith.constant 2 : index
    %c0_55 = arith.constant 0 : index
    %176 = vector.load %arg2[%c2_54, %c0_55] : memref<8x384xf32, #tpu.memory_space<vmem>>, vector<2x384xf32>
    %177 = arith.truncf %140 : vector<2x128xf32> to vector<2x128xbf16>
    %c0_56 = arith.constant 0 : index
    %c0_57 = arith.constant 0 : index
    %178 = vector.load %arg4[%c0_56, %c0_57] : memref<128x384xbf16, #tpu.memory_space<vmem>>, vector<128x384xbf16>
    %cst_58 = arith.constant dense<0.000000e+00> : vector<2x384xf32>
    %179 = tpu.matmul %177, %178, %cst_58 {dimension_numbers = #tpu.dot_dimension_numbers<[1], [0], [0], [1], [0, 0, 1, 1], [], []>} : vector<2x128xbf16>, vector<128x384xbf16>, vector<2x384xf32> -> vector<2x384xf32>
    %180 = vector.extract_strided_slice %176 {offsets = [0, 0], sizes = [2, 128], strides = [1, 1]} : vector<2x384xf32> to vector<2x128xf32>
    %181 = vector.extract_strided_slice %179 {offsets = [0, 0], sizes = [2, 128], strides = [1, 1]} : vector<2x384xf32> to vector<2x128xf32>
    %182 = arith.addf %180, %181 : vector<2x128xf32>
    %183 = arith.negf %182 : vector<2x128xf32>
    %184 = math.exp %183 : vector<2x128xf32>
    %cst_59 = arith.constant 1.000000e+00 : f32
    %185 = vector.broadcast %cst_59 : f32 to vector<2x128xf32>
    %186 = arith.addf %185, %184 : vector<2x128xf32>
    %187 = arith.divf %185, %186 : vector<2x128xf32>
    %188 = vector.extract_strided_slice %176 {offsets = [0, 128], sizes = [2, 128], strides = [1, 1]} : vector<2x384xf32> to vector<2x128xf32>
    %189 = vector.extract_strided_slice %179 {offsets = [0, 128], sizes = [2, 128], strides = [1, 1]} : vector<2x384xf32> to vector<2x128xf32>
    %190 = arith.addf %188, %189 : vector<2x128xf32>
    %191 = arith.negf %190 : vector<2x128xf32>
    %192 = math.exp %191 : vector<2x128xf32>
    %cst_60 = arith.constant 1.000000e+00 : f32
    %193 = vector.broadcast %cst_60 : f32 to vector<2x128xf32>
    %194 = arith.addf %193, %192 : vector<2x128xf32>
    %195 = arith.divf %193, %194 : vector<2x128xf32>
    %196 = vector.extract_strided_slice %176 {offsets = [0, 256], sizes = [2, 128], strides = [1, 1]} : vector<2x384xf32> to vector<2x128xf32>
    %197 = vector.extract_strided_slice %179 {offsets = [0, 256], sizes = [2, 128], strides = [1, 1]} : vector<2x384xf32> to vector<2x128xf32>
    %198 = arith.addf %197, %8 : vector<2x128xf32>
    %199 = arith.mulf %187, %198 : vector<2x128xf32>
    %200 = arith.addf %196, %199 : vector<2x128xf32>
    %201 = math.tanh %200 : vector<2x128xf32>
    %cst_61 = arith.constant 1.000000e+00 : f32
    %202 = vector.broadcast %cst_61 : f32 to vector<2x128xf32>
    %203 = arith.subf %202, %195 : vector<2x128xf32>
    %204 = arith.mulf %203, %201 : vector<2x128xf32>
    %205 = arith.mulf %195, %140 : vector<2x128xf32>
    %206 = arith.addf %204, %205 : vector<2x128xf32>
    %207 = arith.truncf %206 : vector<2x128xf32> to vector<2x128xbf16>
    %c2_62 = arith.constant 2 : index
    %c0_63 = arith.constant 0 : index
    %208 = vector.load %arg8[%c2_62, %c0_63] : memref<8x128xbf16, #tpu.memory_space<vmem>>, vector<2x128xbf16>
    tpu.vector_store %arg8[%c2_62, %c0_63], %207 {strides = array<i32>} : memref<8x128xbf16, #tpu.memory_space<vmem>>, vector<2x128xbf16>,
    %c6_64 = arith.constant 6 : index
    %c0_65 = arith.constant 0 : index
    %209 = vector.load %arg1[%c6_64, %c0_65] : memref<8x384xf32, #tpu.memory_space<vmem>>, vector<2x384xf32>
    %210 = arith.truncf %173 : vector<2x128xf32> to vector<2x128xbf16>
    %c0_66 = arith.constant 0 : index
    %c0_67 = arith.constant 0 : index
    %211 = vector.load %arg3[%c0_66, %c0_67] : memref<128x384xbf16, #tpu.memory_space<vmem>>, vector<128x384xbf16>
    %cst_68 = arith.constant dense<0.000000e+00> : vector<2x384xf32>
    %212 = tpu.matmul %210, %211, %cst_68 {dimension_numbers = #tpu.dot_dimension_numbers<[1], [0], [0], [1], [0, 0, 1, 1], [], []>} : vector<2x128xbf16>, vector<128x384xbf16>, vector<2x384xf32> -> vector<2x384xf32>
    %213 = vector.extract_strided_slice %209 {offsets = [0, 0], sizes = [2, 128], strides = [1, 1]} : vector<2x384xf32> to vector<2x128xf32>
    %214 = vector.extract_strided_slice %212 {offsets = [0, 0], sizes = [2, 128], strides = [1, 1]} : vector<2x384xf32> to vector<2x128xf32>
    %215 = arith.addf %213, %214 : vector<2x128xf32>
    %216 = arith.negf %215 : vector<2x128xf32>
    %217 = math.exp %216 : vector<2x128xf32>
    %cst_69 = arith.constant 1.000000e+00 : f32
    %218 = vector.broadcast %cst_69 : f32 to vector<2x128xf32>
    %219 = arith.addf %218, %217 : vector<2x128xf32>
    %220 = arith.divf %218, %219 : vector<2x128xf32>
    %221 = vector.extract_strided_slice %209 {offsets = [0, 128], sizes = [2, 128], strides = [1, 1]} : vector<2x384xf32> to vector<2x128xf32>
    %222 = vector.extract_strided_slice %212 {offsets = [0, 128], sizes = [2, 128], strides = [1, 1]} : vector<2x384xf32> to vector<2x128xf32>
    %223 = arith.addf %221, %222 : vector<2x128xf32>
    %224 = arith.negf %223 : vector<2x128xf32>
    %225 = math.exp %224 : vector<2x128xf32>
    %cst_70 = arith.constant 1.000000e+00 : f32
    %226 = vector.broadcast %cst_70 : f32 to vector<2x128xf32>
    %227 = arith.addf %226, %225 : vector<2x128xf32>
    %228 = arith.divf %226, %227 : vector<2x128xf32>
    %229 = vector.extract_strided_slice %209 {offsets = [0, 256], sizes = [2, 128], strides = [1, 1]} : vector<2x384xf32> to vector<2x128xf32>
    %230 = vector.extract_strided_slice %212 {offsets = [0, 256], sizes = [2, 128], strides = [1, 1]} : vector<2x384xf32> to vector<2x128xf32>
    %231 = arith.addf %230, %5 : vector<2x128xf32>
    %232 = arith.mulf %220, %231 : vector<2x128xf32>
    %233 = arith.addf %229, %232 : vector<2x128xf32>
    %234 = math.tanh %233 : vector<2x128xf32>
    %cst_71 = arith.constant 1.000000e+00 : f32
    %235 = vector.broadcast %cst_71 : f32 to vector<2x128xf32>
    %236 = arith.subf %235, %228 : vector<2x128xf32>
    %237 = arith.mulf %236, %234 : vector<2x128xf32>
    %238 = arith.mulf %228, %173 : vector<2x128xf32>
    %239 = arith.addf %237, %238 : vector<2x128xf32>
    %240 = arith.truncf %239 : vector<2x128xf32> to vector<2x128xbf16>
    %c6_72 = arith.constant 6 : index
    %c0_73 = arith.constant 0 : index
    %241 = vector.load %arg7[%c6_72, %c0_73] : memref<8x128xbf16, #tpu.memory_space<vmem>>, vector<2x128xbf16>
    tpu.vector_store %arg7[%c6_72, %c0_73], %240 {strides = array<i32>} : memref<8x128xbf16, #tpu.memory_space<vmem>>, vector<2x128xbf16>,
    %c0_74 = arith.constant 0 : index
    %c0_75 = arith.constant 0 : index
    %242 = vector.load %arg2[%c0_74, %c0_75] : memref<8x384xf32, #tpu.memory_space<vmem>>, vector<2x384xf32>
    %243 = arith.truncf %206 : vector<2x128xf32> to vector<2x128xbf16>
    %c0_76 = arith.constant 0 : index
    %c0_77 = arith.constant 0 : index
    %244 = vector.load %arg4[%c0_76, %c0_77] : memref<128x384xbf16, #tpu.memory_space<vmem>>, vector<128x384xbf16>
    %cst_78 = arith.constant dense<0.000000e+00> : vector<2x384xf32>
    %245 = tpu.matmul %243, %244, %cst_78 {dimension_numbers = #tpu.dot_dimension_numbers<[1], [0], [0], [1], [0, 0, 1, 1], [], []>} : vector<2x128xbf16>, vector<128x384xbf16>, vector<2x384xf32> -> vector<2x384xf32>
    %246 = vector.extract_strided_slice %242 {offsets = [0, 0], sizes = [2, 128], strides = [1, 1]} : vector<2x384xf32> to vector<2x128xf32>
    %247 = vector.extract_strided_slice %245 {offsets = [0, 0], sizes = [2, 128], strides = [1, 1]} : vector<2x384xf32> to vector<2x128xf32>
    %248 = arith.addf %246, %247 : vector<2x128xf32>
    %249 = arith.negf %248 : vector<2x128xf32>
    %250 = math.exp %249 : vector<2x128xf32>
    %cst_79 = arith.constant 1.000000e+00 : f32
    %251 = vector.broadcast %cst_79 : f32 to vector<2x128xf32>
    %252 = arith.addf %251, %250 : vector<2x128xf32>
    %253 = arith.divf %251, %252 : vector<2x128xf32>
    %254 = vector.extract_strided_slice %242 {offsets = [0, 128], sizes = [2, 128], strides = [1, 1]} : vector<2x384xf32> to vector<2x128xf32>
    %255 = vector.extract_strided_slice %245 {offsets = [0, 128], sizes = [2, 128], strides = [1, 1]} : vector<2x384xf32> to vector<2x128xf32>
    %256 = arith.addf %254, %255 : vector<2x128xf32>
    %257 = arith.negf %256 : vector<2x128xf32>
    %258 = math.exp %257 : vector<2x128xf32>
    %cst_80 = arith.constant 1.000000e+00 : f32
    %259 = vector.broadcast %cst_80 : f32 to vector<2x128xf32>
    %260 = arith.addf %259, %258 : vector<2x128xf32>
    %261 = arith.divf %259, %260 : vector<2x128xf32>
    %262 = vector.extract_strided_slice %242 {offsets = [0, 256], sizes = [2, 128], strides = [1, 1]} : vector<2x384xf32> to vector<2x128xf32>
    %263 = vector.extract_strided_slice %245 {offsets = [0, 256], sizes = [2, 128], strides = [1, 1]} : vector<2x384xf32> to vector<2x128xf32>
    %264 = arith.addf %263, %8 : vector<2x128xf32>
    %265 = arith.mulf %253, %264 : vector<2x128xf32>
    %266 = arith.addf %262, %265 : vector<2x128xf32>
    %267 = math.tanh %266 : vector<2x128xf32>
    %cst_81 = arith.constant 1.000000e+00 : f32
    %268 = vector.broadcast %cst_81 : f32 to vector<2x128xf32>
    %269 = arith.subf %268, %261 : vector<2x128xf32>
    %270 = arith.mulf %269, %267 : vector<2x128xf32>
    %271 = arith.mulf %261, %206 : vector<2x128xf32>
    %272 = arith.addf %270, %271 : vector<2x128xf32>
    %273 = arith.truncf %272 : vector<2x128xf32> to vector<2x128xbf16>
    %c0_82 = arith.constant 0 : index
    %c0_83 = arith.constant 0 : index
    %274 = vector.load %arg8[%c0_82, %c0_83] : memref<8x128xbf16, #tpu.memory_space<vmem>>, vector<2x128xbf16>
    tpu.vector_store %arg8[%c0_82, %c0_83], %273 {strides = array<i32>} : memref<8x128xbf16, #tpu.memory_space<vmem>>, vector<2x128xbf16>,
    %c0_84 = arith.constant 0 : index
    %c0_85 = arith.constant 0 : index
    %275 = vector.load %arg11[%c0_84, %c0_85] : memref<2x128xf32, #tpu.memory_space<vmem>>, vector<2x128xf32>
    tpu.vector_store %arg11[%c0_84, %c0_85], %239 {strides = array<i32>} : memref<2x128xf32, #tpu.memory_space<vmem>>, vector<2x128xf32>,
    %c0_86 = arith.constant 0 : index
    %c0_87 = arith.constant 0 : index
    %276 = vector.load %arg12[%c0_86, %c0_87] : memref<2x128xf32, #tpu.memory_space<vmem>>, vector<2x128xf32>
    tpu.vector_store %arg12[%c0_86, %c0_87], %272 {strides = array<i32>} : memref<2x128xf32, #tpu.memory_space<vmem>>, vector<2x128xf32>,
    %c0_88 = arith.constant 0 : index
    %c0_89 = arith.constant 0 : index
    %277 = vector.load %arg9[%c0_88, %c0_89] : memref<2x128xf32, #tpu.memory_space<vmem>>, vector<2x128xf32>
    tpu.vector_store %arg9[%c0_88, %c0_89], %239 {strides = array<i32>} : memref<2x128xf32, #tpu.memory_space<vmem>>, vector<2x128xf32>,
    %c0_90 = arith.constant 0 : index
    %c0_91 = arith.constant 0 : index
    %278 = vector.load %arg10[%c0_90, %c0_91] : memref<2x128xf32, #tpu.memory_space<vmem>>, vector<2x128xf32>
    tpu.vector_store %arg10[%c0_90, %c0_91], %272 {strides = array<i32>} : memref<2x128xf32, #tpu.memory_space<vmem>>, vector<2x128xf32>,
    return
  }
  func.func @transform_0(%arg0: i32) -> (i32, i32) {
    %c0_i32 = arith.constant 0 : i32
    %c0_i32_0 = arith.constant 0 : i32
    return %arg0, %c0_i32 : i32, i32
  }
  func.func @transform_1(%arg0: i32) -> (i32, i32) {
    %c1_i32 = arith.constant 1 : i32
    %0 = arith.subi %c1_i32, %arg0 : i32
    %c0_i32 = arith.constant 0 : i32
    %c0_i32_0 = arith.constant 0 : i32
    return %0, %c0_i32 : i32, i32
  }
  func.func @transform_2(%arg0: i32) -> (i32, i32) {
    %c0_i32 = arith.constant 0 : i32
    %c0_i32_0 = arith.constant 0 : i32
    %c0_i32_1 = arith.constant 0 : i32
    return %c0_i32, %c0_i32_0 : i32, i32
  }
  func.func @transform_3(%arg0: i32) -> (i32, i32) {
    %c0_i32 = arith.constant 0 : i32
    %c0_i32_0 = arith.constant 0 : i32
    %c0_i32_1 = arith.constant 0 : i32
    return %c0_i32, %c0_i32_0 : i32, i32
  }
  func.func @transform_4(%arg0: i32) -> (i32, i32) {
    %c0_i32 = arith.constant 0 : i32
    %c0_i32_0 = arith.constant 0 : i32
    %c0_i32_1 = arith.constant 0 : i32
    return %c0_i32, %c0_i32_0 : i32, i32
  }
  func.func @transform_5(%arg0: i32) -> (i32, i32) {
    %c0_i32 = arith.constant 0 : i32
    %c0_i32_0 = arith.constant 0 : i32
    %c0_i32_1 = arith.constant 0 : i32
    return %c0_i32, %c0_i32_0 : i32, i32
  }
  func.func @transform_6(%arg0: i32) -> (i32, i32) {
    %c0_i32 = arith.constant 0 : i32
    %c0_i32_0 = arith.constant 0 : i32
    return %arg0, %c0_i32 : i32, i32
  }
  func.func @transform_7(%arg0: i32) -> (i32, i32) {
    %c1_i32 = arith.constant 1 : i32
    %0 = arith.subi %c1_i32, %arg0 : i32
    %c0_i32 = arith.constant 0 : i32
    %c0_i32_0 = arith.constant 0 : i32
    return %0, %c0_i32 : i32, i32
  }
  func.func @transform_8(%arg0: i32) -> (i32, i32) {
    %c0_i32 = arith.constant 0 : i32
    %c0_i32_0 = arith.constant 0 : i32
    %c0_i32_1 = arith.constant 0 : i32
    return %c0_i32, %c0_i32_0 : i32, i32
  }
  func.func @transform_9(%arg0: i32) -> (i32, i32) {
    %c0_i32 = arith.constant 0 : i32
    %c0_i32_0 = arith.constant 0 : i32
    %c0_i32_1 = arith.constant 0 : i32
    return %c0_i32, %c0_i32_0 : i32, i32
  }
}

</mosaic_0001>

<bundles_post_ra>
// kernel: seq_encoder_forward.2
= control target key start
LH: loop header
LB: loop body
LE: loop exit
PB: predicated region body
PF: predicated region fallthrough
CT: control target
= control target key end

     0   :  { %s3512_s30 = smov 0   ;;  %s4349_s0 = inlined_call_operand.vmem [shape: f32[16,384], index: 0, kind: input, shape index: {}]   ;;  %s4350_s1 = inlined_call_operand.vmem [shape: f32[16,384], index: 1, kind: input, shape index: {}]   ;;  %s4351_s2 = inlined_call_operand.vmem [shape: bf16[128,384], index: 2, kind: input, shape index: {}]   ;;  %s4352_s3 = inlined_call_operand.vmem [shape: bf16[128,384], index: 3, kind: input, shape index: {}]   ;;  %s4353_s4 = inlined_call_operand.vmem [shape: f32[1,128], index: 4, kind: input, shape index: {}]   ;;  %s4354_s5 = inlined_call_operand.vmem [shape: f32[1,128], index: 5, kind: input, shape index: {}]   ;;  %s4355_s6 = inlined_call_operand.vmem [shape: bf16[16,128], index: 6, kind: output, shape index: {0}]   ;;  %s4356_s7 = inlined_call_operand.vmem [shape: bf16[16,128], index: 7, kind: output, shape index: {1}]   ;;  %s4357_s8 = inlined_call_operand.vmem [shape: f32[2,128], index: 8, kind: output, shape index: {2}]   ;;  %s4358_s9 = inlined_call_operand.vmem [shape: f32[2,128], index: 9, kind: output, shape index: {3}]  }
   0x1 LB: > { %s2742_s10 = sadd.s32 4294967295, %s3456_s30   ;;  %p2746_p0 = scmp.ge.s32.totalorder %s3456_s30, 1  ;;  %s3456_s30 = sphi %s3512_s30, %s20_s30  }
   0x2   : > { %p300_p1 = scmp.lt.s32.totalorder %s3456_s30, 3 }
   0x4   : > { %p301_p2 = pnand %p2746_p0, %p300_p1 }
   0x5   : > { %p346_p3 = scmp.lt.s32.totalorder (!%p301_p2), %s2742_s10, 1  ;;  %s351_s11 = ssub.s32 (!%p301_p2), 1, %s2742_s10 }
   0x6   : > { %304 = sbr.rel (%p301_p2) target bundleno = 1103 (0x44f), region = 44  ;;  %p352_p4 = scmp.lt.s32.totalorder (!%p301_p2), %s351_s11, 1 }
   0x7   : > { %p2751_p5 = scmp.ne.s32.totalorder (!%p301_p2), %s2742_s10, 0 }
   0xb   : > { %s347_s12 = scalar_select %p346_p3, %s2742_s10, 1 }
   0xc   : > { %s4360_s11 = smov (!%p352_p4, %s351_s11), 1  ;;  %372 = sbr.rel (%p2751_p5) target bundleno = 19 (0x13), region = 48 }
   0xd   : > { %s3196_s13 = smul.u32 24, %s347_s12  ;;  %s2749_s14 = sshll.u32 %s347_s12, 2 }
   0xe   : > { %s3197_s15 = smul.u32 24, %s4360_s11  ;;  %s3523_s18 = scalar_lea.vmem %s4355_s6, %s2749_s14 }
   0xf   : > { %s3528_s21 = scalar_lea.vmem %s4349_s0, %s3196_s13  ;;  %s2750_s22 = sshll.u32 %s4360_s11, 2 }
  0x10   : > { %s3533_s25 = scalar_lea.vmem %s4350_s1, %s3197_s15  ;;  %s3538_s28 = scalar_lea.vmem %s4356_s7, %s2750_s22 }
  0x11   : > { %v3458_v0 = vmov 0.0  }
  0x12   : > { %373 = vst [vmem:[#allocation2] sm:$0x3] %v3458_v0  ;;  %374 = vst [vmem:[#allocation3] sm:$0x3] %v3458_v0 }
  0x13 PF: > { %v3543_v1 = vld [vmem:[%s4351_s2 + $0xac] ss:$12 sps:$4 sm:$0xff]   ;;  %v3548_v2 = vld [vmem:[%s4351_s2 + $0xa8] ss:$12 sps:$4 sm:$0xff]   ;;  %v3459_v3 = vmov 0.0   ;;  %v3460_v4 = vmov 0  }
  0x14   : > { %3036 = vmatprep.subr.bf16.mxu1 %v3459_v3  ;;  %587 = vmatprep.mubr.bf16.mxu0 %v3460_v4  ;;  %v3556_v5 = vld [vmem:[%s4351_s2 + $0x94] ss:$12 sps:$4 sm:$0xff]   ;;  %vm3461_vm0 = vmmov 0   ;;  %v3564_v6 = vld [vmem:[%s4351_s2 + $0x90] ss:$12 sps:$4 sm:$0xff]  }
  0x15   : > { %555 = vmatprep.subr.bf16.mxu0 %v3543_v1  ;;  %3052 = vmatprep.mubr.msk.bf16.mxu1 %vm3461_vm0, %v3459_v3  ;;  %v3570_v7 = vld [vmem:[%s4351_s2 + $0x7c] ss:$12 sps:$4 sm:$0xff]   ;;  %v3576_v8 = vld [vmem:[%s4351_s2 + $0x78] ss:$12 sps:$4 sm:$0xff]   ;;  %v3591_v11 = vld [vmem:[%s4351_s2 + $0x60] ss:$12 sps:$4 sm:$0xff]  }
  0x16   : > { %556 = vmatpush1.bf16.msra.mxu0 %v3548_v2  ;;  %v3582_v9 = vld [vmem:[%s4351_s2 + $0x64] ss:$12 sps:$4 sm:$0xff]   ;;  %v3597_v12 = vld [vmem:[%s4351_s2 + $0x4c] ss:$12 sps:$4 sm:$0xff]   ;;  %v3607_v14 = vld [vmem:[%s4351_s2 + $0x48] ss:$12 sps:$4 sm:$0xff]  }
  0x17   : > { %557 = vmatprep.subr.bf16.mxu0 %v3556_v5  ;;  %v3231_v10 = vld [vmem:[%s4351_s2 + $0xb0] ss:$12 sps:$4 sm:$0xff]   ;;  %v3235_v13 = vld [vmem:[%s4351_s2 + $0x98] ss:$12 sps:$4 sm:$0xff]   ;;  %v3613_v15 = vld [vmem:[%s4351_s2 + $0x34] ss:$12 sps:$4 sm:$0xff]  }
  0x18   : > { %3037 = vmatpush3.bf16.msra.mxu1 %v3231_v10  ;;  %v3239_v16 = vld [vmem:[%s4351_s2 + $0x80] ss:$12 sps:$4 sm:$0xff]   ;;  %v3622_v17 = vld [vmem:[%s4351_s2 + $0x30] ss:$12 sps:$4 sm:$0xff]   ;;  %v3243_v19 = vld [vmem:[%s4351_s2 + $0x68] ss:$12 sps:$4 sm:$0xff]  }
  0x19   : > { %3038 = vmatprep.subr.bf16.mxu1 %v3459_v3  ;;  %v3628_v18 = vld [vmem:[%s4351_s2 + $0x1c] ss:$12 sps:$4 sm:$0xff]   ;;  %v3639_v20 = vld [vmem:[%s4351_s2 + $0x18] ss:$12 sps:$4 sm:$0xff]   ;;  %v3653_v23 = vld [vmem:[%s4351_s2] ss:$12 sps:$4 sm:$0xff]  }
  0x1a   : > { %558 = vmatpush1.bf16.msra.mxu0 %v3564_v6  ;;  %v3644_v21 = vld [vmem:[%s4351_s2 + $0x4] ss:$12 sps:$4 sm:$0xff]   ;;  %v3656_v24 = vld [vmem:[#allocation2] sm:$0x3]  ;;  %v3662_v25 = vld [vmem:[%s4352_s3 + $0xac] ss:$12 sps:$4 sm:$0xff]  }
  0x1b   : > { %559 = vmatprep.subr.bf16.mxu0 %v3570_v7  ;;  %v3247_v22 = vld [vmem:[%s4351_s2 + $0x50] ss:$12 sps:$4 sm:$0xff]   ;;  %v3251_v26 = vld [vmem:[%s4351_s2 + $0x38] ss:$12 sps:$4 sm:$0xff]   ;;  %v394_v27 = vpack.c.bf16 %v3656_v24, %v3656_v24  ;;  %v3674_v28 = vld [vmem:[%s4352_s3 + $0xa8] ss:$12 sps:$4 sm:$0xff]  }
  0x1c   : > { %3039 = vmatpush3.bf16.msra.mxu1 %v3235_v13  ;;  %v3680_v29 = vld [vmem:[%s4352_s3 + $0x94] ss:$12 sps:$4 sm:$0xff]   ;;  %v3690_v31 = vld [vmem:[%s4352_s3 + $0x90] ss:$12 sps:$4 sm:$0xff]   ;;  %v3706_v34 = vld [vmem:[%s4352_s3 + $0x78] ss:$12 sps:$4 sm:$0xff]  }
  0x1d   : > { %3040 = vmatprep.subr.bf16.mxu1 %v3459_v3  ;;  %v3255_v30 = vld [vmem:[%s4351_s2 + $0x20] ss:$12 sps:$4 sm:$0xff]   ;;  %v3696_v32 = vld [vmem:[%s4352_s3 + $0x7c] ss:$12 sps:$4 sm:$0xff]   ;;  %v3712_v35 = vld [vmem:[%s4352_s3 + $0x64] ss:$12 sps:$4 sm:$0xff]  }
  0x1e   : > { %560 = vmatpush1.bf16.msra.mxu0 %v3576_v8  ;;  %v3259_v33 = vld [vmem:[%s4351_s2 + $0x8] ss:$12 sps:$4 sm:$0xff]   ;;  %v3263_v36 = vld [vmem:[%s4352_s3 + $0xb0] ss:$12 sps:$4 sm:$0xff]   ;;  %v3722_v37 = vld [vmem:[%s4352_s3 + $0x60] ss:$12 sps:$4 sm:$0xff]  }
  0x1f   : > { %561 = vmatprep.subr.bf16.mxu0 %v3582_v9  ;;  %v3728_v38 = vld [vmem:[%s4352_s3 + $0x4c] ss:$12 sps:$4 sm:$0xff]   ;;  %v3738_v40 = vld [vmem:[%s4352_s3 + $0x48] ss:$12 sps:$4 sm:$0xff]   ;;  %v3756_v43 = vld [vmem:[%s4352_s3 + $0x30] ss:$12 sps:$4 sm:$0xff]  }
  0x20   : > { %3041 = vmatpush3.bf16.msra.mxu1 %v3239_v16  ;;  %v3267_v39 = vld [vmem:[%s4352_s3 + $0x98] ss:$12 sps:$4 sm:$0xff]   ;;  %v3746_v41 = vld [vmem:[%s4352_s3 + $0x34] ss:$12 sps:$4 sm:$0xff]   ;;  %v3762_v44 = vld [vmem:[%s4352_s3 + $0x1c] ss:$12 sps:$4 sm:$0xff]  }
  0x21   : > { %3042 = vmatprep.subr.bf16.mxu1 %v3459_v3  ;;  %v3268_v42 = vld [vmem:[%s4352_s3 + $0x80] ss:$12 sps:$4 sm:$0xff]   ;;  %v3269_v45 = vld [vmem:[%s4352_s3 + $0x68] ss:$12 sps:$4 sm:$0xff]   ;;  %v3772_v46 = vld [vmem:[%s4352_s3 + $0x18] ss:$12 sps:$4 sm:$0xff]  }
  0x22   : > { %562 = vmatpush1.bf16.msra.mxu0 %v3591_v11  ;;  %v3778_v47 = vld [vmem:[%s4352_s3 + $0x4] ss:$12 sps:$4 sm:$0xff]   ;;  %v3788_v49 = vld [vmem:[%s4352_s3] ss:$12 sps:$4 sm:$0xff]   ;;  %v3273_v54 = vld [vmem:[%s4352_s3 + $0x8] ss:$12 sps:$4 sm:$0xff]  }
  0x23   : > { %563 = vmatprep.subr.bf16.mxu0 %v3597_v12  ;;  %v3270_v48 = vld [vmem:[%s4352_s3 + $0x50] ss:$12 sps:$4 sm:$0xff]   ;;  %v3790_v50 = vld [vmem:[#allocation3] sm:$0x3]  ;;  %v3271_v51 = vld [vmem:[%s4352_s3 + $0x38] ss:$12 sps:$4 sm:$0xff]  }
  0x24   : > { %3043 = vmatpush3.bf16.msra.mxu1 %v3243_v19  ;;  %v663_v52 = vpack.c.bf16 %v3790_v50, %v3790_v50  ;;  %v3272_v53 = vld [vmem:[%s4352_s3 + $0x20] ss:$12 sps:$4 sm:$0xff]   ;;  %v3274_v55 = vld [vmem:[%s4351_s2 + $0xb0] ss:$12 sps:$4 sm:$0xff]   ;;  %v3275_v56 = vld [vmem:[%s4351_s2 + $0x98] ss:$12 sps:$4 sm:$0xff]  }
  0x25   : > { %3044 = vmatprep.subr.bf16.mxu1 %v3459_v3  ;;  %v3276_v57 = vld [vmem:[%s4351_s2 + $0x80] ss:$12 sps:$4 sm:$0xff]   ;;  %v3277_v58 = vld [vmem:[%s4351_s2 + $0x68] ss:$12 sps:$4 sm:$0xff]   ;;  %v3278_v59 = vld [vmem:[%s4351_s2 + $0x50] ss:$12 sps:$4 sm:$0xff]  }
  0x26   : > { %564 = vmatpush1.bf16.msra.mxu0 %v3607_v14  ;;  %v3279_v60 = vld [vmem:[%s4351_s2 + $0x38] ss:$12 sps:$4 sm:$0xff]   ;;  %v3280_v61 = vld [vmem:[%s4351_s2 + $0x20] ss:$12 sps:$4 sm:$0xff]   ;;  %v3281_v62 = vld [vmem:[%s4351_s2 + $0x8] ss:$12 sps:$4 sm:$0xff]  }
  0x27   : > { %565 = vmatprep.subr.bf16.mxu0 %v3613_v15  ;;  %v391_v63 = vld [vmem:[%s3528_s21] sm:$0x3] }
  0x28   : > { %3045 = vmatpush3.bf16.msra.mxu1 %v3247_v22 }
  0x29   : > { %3046 = vmatprep.subr.bf16.mxu1 %v3459_v3 }
  0x2a   : > { %566 = vmatpush1.bf16.msra.mxu0 %v3622_v17 }
  0x2b   : > { %567 = vmatprep.subr.bf16.mxu0 %v3628_v18 }
  0x2c   : > { %3047 = vmatpush3.bf16.msra.mxu1 %v3251_v26 }
  0x2d   : > { %3048 = vmatprep.subr.bf16.mxu1 %v3459_v3 }
  0x2e   : > { %568 = vmatpush1.bf16.msra.mxu0 %v3639_v20 }
  0x2f   : > { %569 = vmatprep.subr.bf16.mxu0 %v3644_v21 }
  0x30   : > { %3049 = vmatpush3.bf16.msra.mxu1 %v3255_v30  ;;  %v660_v30 = vld [vmem:[%s3533_s25] sm:$0xc0] }
  0x31   : > { %3050 = vmatprep.subr.bf16.mxu1 %v3459_v3 }
  0x32   : > { %570 = vmatpush1.bf16.msra.mxu0 %v3653_v23 }
  0x33   : > { %824 = vmatprep.subr.bf16.mxu0 %v3662_v25 }
  0x34   : > { %3051 = vmatpush3.bf16.msra.mxu1 %v3259_v33 }
  0x35   : > { %588 = vmatmul.mubr.bf16.vlgmr.msra.gmra.mxu0 %v394_v27  ;;  %3056 = vmatprep.subr.bf16.mxu1 %v3459_v3 }
  0x36   : > { %825 = vmatpush1.bf16.msra.mxu0 %v3674_v28  ;;  %856 = vmatprep.mubr.bf16.mxu0 %v3460_v4 }
  0x37   : > { %826 = vmatprep.subr.bf16.mxu0 %v3680_v29  ;;  %3053 = vmatmul.mubr.bf16.vlgmr.msra.gmra.mxu1 %v394_v27 }
  0x38   : > { %3057 = vmatpush3.bf16.msra.mxu1 %v3263_v36  ;;  %3072 = vmatprep.mubr.msk.bf16.mxu1 %vm3461_vm0, %v3459_v3 }
  0x39   : > { %3058 = vmatprep.subr.bf16.mxu1 %v3459_v3 }
  0x3a   : > { %827 = vmatpush1.bf16.msra.mxu0 %v3690_v31 }
  0x3b   : > { %828 = vmatprep.subr.bf16.mxu0 %v3696_v32 }
  0x3c   : > { %3059 = vmatpush3.bf16.msra.mxu1 %v3267_v39 }
  0x3d   : > { %3060 = vmatprep.subr.bf16.mxu1 %v3459_v3 }
  0x3e   : > { %829 = vmatpush1.bf16.msra.mxu0 %v3706_v34 }
  0x3f   : > { %830 = vmatprep.subr.bf16.mxu0 %v3712_v35 }
  0x40   : > { %3061 = vmatpush3.bf16.msra.mxu1 %v3268_v42  ;;  %v393_v42 = vld [vmem:[%s3528_s21 + $0x10] sm:$0x3] }
  0x41   : > { %3062 = vmatprep.subr.bf16.mxu1 %v3459_v3 }
  0x42   : > { %831 = vmatpush1.bf16.msra.mxu0 %v3722_v37 }
  0x43   : > { %832 = vmatprep.subr.bf16.mxu0 %v3728_v38 }
  0x44   : > { %3063 = vmatpush3.bf16.msra.mxu1 %v3269_v45 }
  0x45   : > { %3064 = vmatprep.subr.bf16.mxu1 %v3459_v3 }
  0x46   : > { %833 = vmatpush1.bf16.msra.mxu0 %v3738_v40 }
  0x47   : > { %834 = vmatprep.subr.bf16.mxu0 %v3746_v41 }
  0x48   : > { %3065 = vmatpush3.bf16.msra.mxu1 %v3270_v48 }
  0x49   : > { %3066 = vmatprep.subr.bf16.mxu1 %v3459_v3 }
  0x4a   : > { %835 = vmatpush1.bf16.msra.mxu0 %v3756_v43 }
  0x4b   : > { %836 = vmatprep.subr.bf16.mxu0 %v3762_v44 }
  0x4c   : > { %3067 = vmatpush3.bf16.msra.mxu1 %v3271_v51 }
  0x4d   : > { %3068 = vmatprep.subr.bf16.mxu1 %v3459_v3 }
  0x4e   : > { %837 = vmatpush1.bf16.msra.mxu0 %v3772_v46 }
  0x4f   : > { %838 = vmatprep.subr.bf16.mxu0 %v3778_v47 }
  0x50   : > { %3069 = vmatpush3.bf16.msra.mxu1 %v3272_v53 }
  0x51   : > { %3070 = vmatprep.subr.bf16.mxu1 %v3459_v3 }
  0x52   : > { %839 = vmatpush1.bf16.msra.mxu0 %v3788_v49 }
  0x53   : > { %1104 = vmatprep.subr.bf16.mxu0 %v3543_v1 }
  0x54   : > { %3071 = vmatpush3.bf16.msra.mxu1 %v3273_v54 }
  0x55   : > { %857 = vmatmul.mubr.bf16.vlgmr.msra.gmra.mxu0 %v663_v52  ;;  %3076 = vmatprep.subr.bf16.mxu1 %v3459_v3 }
  0x56   : > { %1105 = vmatpush1.bf16.msra.mxu0 %v3548_v2  ;;  %1136 = vmatprep.mubr.bf16.mxu0 %v3460_v4 }
  0x57   : > { %1106 = vmatprep.subr.bf16.mxu0 %v3556_v5  ;;  %3073 = vmatmul.mubr.bf16.vlgmr.msra.gmra.mxu1 %v663_v52 }
  0x58   : > { %3092 = vmatprep.mubr.msk.bf16.mxu1 %vm3461_vm0, %v3459_v3  ;;  %3077 = vmatpush3.bf16.msra.mxu1 %v3274_v55 }
  0x59   : > { %3078 = vmatprep.subr.bf16.mxu1 %v3459_v3 }
  0x5a   : > { %1107 = vmatpush1.bf16.msra.mxu0 %v3564_v6 }
  0x5b   : > { %1108 = vmatprep.subr.bf16.mxu0 %v3570_v7 }
  0x5c   : > { %3079 = vmatpush3.bf16.msra.mxu1 %v3275_v56 }
  0x5d   : > { %3080 = vmatprep.subr.bf16.mxu1 %v3459_v3 }
  0x5e   : > { %1109 = vmatpush1.bf16.msra.mxu0 %v3576_v8 }
  0x5f   : > { %1110 = vmatprep.subr.bf16.mxu0 %v3582_v9 }
  0x60   : > { %3081 = vmatpush3.bf16.msra.mxu1 %v3276_v57  ;;  %v661_v57 = vld [vmem:[%s3533_s25 + $0x8] sm:$0xc0] }
  0x61   : > { %3082 = vmatprep.subr.bf16.mxu1 %v3459_v3 }
  0x62   : > { %1111 = vmatpush1.bf16.msra.mxu0 %v3591_v11 }
  0x63   : > { %1112 = vmatprep.subr.bf16.mxu0 %v3597_v12  ;;  %v392_v12 = vld [vmem:[%s3528_s21 + $0x8] sm:$0x3] }
  0x64   : > { %3083 = vmatpush3.bf16.msra.mxu1 %v3277_v58 }
  0x65   : > { %3084 = vmatprep.subr.bf16.mxu1 %v3459_v3 }
  0x66   : > { %1113 = vmatpush1.bf16.msra.mxu0 %v3607_v14 }
  0x67   : > { %1114 = vmatprep.subr.bf16.mxu0 %v3613_v15 }
  0x68   : > { %3085 = vmatpush3.bf16.msra.mxu1 %v3278_v59 }
  0x69   : > { %3086 = vmatprep.subr.bf16.mxu1 %v3459_v3 }
  0x6a   : > { %1115 = vmatpush1.bf16.msra.mxu0 %v3622_v17 }
  0x6b   : > { %1116 = vmatprep.subr.bf16.mxu0 %v3628_v18 }
  0x6c   : > { %3087 = vmatpush3.bf16.msra.mxu1 %v3279_v60 }
  0x6d   : > { %3088 = vmatprep.subr.bf16.mxu1 %v3459_v3 }
  0x6e   : > { %1117 = vmatpush1.bf16.msra.mxu0 %v3639_v20 }
  0x6f   : > { %1118 = vmatprep.subr.bf16.mxu0 %v3644_v21 }
  0x70   : > { %3089 = vmatpush3.bf16.msra.mxu1 %v3280_v61 }
  0x71   : > { %3090 = vmatprep.subr.bf16.mxu1 %v3459_v3 }
  0x72   : > { %1119 = vmatpush1.bf16.msra.mxu0 %v3653_v23 }
  0x73   : > { %1387 = vmatprep.subr.bf16.mxu0 %v3662_v25  ;;  %v3868_v25 = vld [vmem:[%s4353_s4] ss:$0 sm:$0xff] }
  0x74   : > { %3091 = vmatpush3.bf16.msra.mxu1 %v3281_v62 }
  0x75   : > { %3096 = vmatprep.subr.bf16.mxu1 %v3459_v3 }
  0xf5   : > { %v589_v0 = vpop.f32.mrf.mxu0 }
  0xf6   : > { %v636_v9 = vadd.f32 %v589_v0, %v391_v63 }
  0xf7   : > { %v591_v10 = vpop.f32.mrf.mxu0  ;;  %v630_v16 = vpop.f32.mrf.mxu1 }
  0xf8   : > { %v2778_v11 = vmul.f32 -1.442695, %v636_v9  ;;  %v643_v15 = vadd.f32 %v591_v10, %v392_v12  ;;  %v650_v27 = vadd.f32 %v3868_v25, %v630_v16  ;;  %v3282_v16 = vld [vmem:[%s4352_s3 + $0xb0] ss:$12 sps:$4 sm:$0xff]  }
  0xf9   : > { %v593_v13 = vpop.f32.mrf.mxu0  ;;  %v3054_v18 = vpop.f32.mrf.mxu1 }
  0xfa   : > { %3370 = vpow2.f32 %v2778_v11  ;;  %v2779_v17 = vmul.f32 -1.442695, %v643_v15  ;;  %v3885_v18 = vld [vmem:[%s4354_s5] ss:$0 sm:$0xff] }
  0xfb   : > { %v594_v14 = vpop.f32.mrf.mxu0  ;;  %v633_v19 = vpop.f32.mrf.mxu1 }
  0xfc   : > { %3372 = vpow2.f32 %v2779_v17 }
  0xfd   : > { %v3055_v20 = vpop.f32.mrf.mxu1 }
 0x107   : > { %v3371_v21 = vpop.eup %3370 }
 0x108   : > { %v640_v22 = vadd.f32 1.0, %v3371_v21 }
 0x109   : > { %v3373_v23 = vpop.eup %3372 }
 0x10a   : > { %3374 = vrcp.f32 %v640_v22  ;;  %v647_v26 = vadd.f32 1.0, %v3373_v23  ;;  %v3285_v22 = vld [vmem:[%s4352_s3 + $0x68] ss:$12 sps:$4 sm:$0xff]  }
 0x10c   : > { %3376 = vrcp.f32 %v647_v26 }
 0x115   : > { %v858_v33 = vpop.f32.mrf.mxu0 }
 0x116   : > { %v906_v36 = vrot.slane %v858_v33, 2  ;;  %v3988_v33 = vld [vmem:[%s4351_s2 + $0x48] ss:$12 sps:$4 sm:$0xff]  }
 0x117   : > { %v3375_v39 = vpop.eup %3374  ;;  %v860_v45 = vpop.f32.mrf.mxu0 }
 0x118   : > { %v651_v48 = vmul.f32 %v3375_v39, %v650_v27  ;;  %v908_v51 = vadd.f32 %v906_v36, %v660_v30  ;;  %v916_v55 = vrot.slane %v860_v45, 2  ;;  %v899_v58 = vpop.f32.mrf.mxu1  ;;  %v3300_v36 = vld [vmem:[%s4351_s2 + $0x50] ss:$12 sps:$4 sm:$0xff]   ;;  %v3998_v39 = vld [vmem:[%s4351_s2 + $0x34] ss:$12 sps:$4 sm:$0xff]  }
 0x119   : > { %v862_v52 = vpop.f32.mrf.mxu0  ;;  %v3377_v0 = vpop.eup %3376  ;;  %v925_v19 = vadd.f32 %v3885_v18, %v899_v58  ;;  %v3304_v45 = vld [vmem:[%s4351_s2 + $0x38] ss:$12 sps:$4 sm:$0xff]  }
 0x11a   : > { %v652_v53 = vadd.f32 %v651_v48, %v393_v42  ;;  %v2804_v54 = vmul.f32 -1.442695, %v908_v51  ;;  %v918_v59 = vadd.f32 %v916_v55, %v661_v57  ;;  %v3074_v60 = vpop.f32.mrf.mxu1  ;;  %v654_v9 = vsub.f32 1.0, %v3377_v0  ;;  %v4004_v42 = vld [vmem:[%s4351_s2 + $0x30] ss:$12 sps:$4 sm:$0xff]  }
 0x11b   : > { %v863_v56 = vpop.f32.mrf.mxu0  ;;  %v656_v13 = vmul.f32 %v3377_v0, %v3656_v24  ;;  %v3283_v24 = vld [vmem:[%s4352_s3 + $0x98] ss:$12 sps:$4 sm:$0xff]   ;;  %v927_v21 = vrot.slane %v925_v19, 2  ;;  %v4014_v48 = vld [vmem:[%s4351_s2 + $0x1c] ss:$12 sps:$4 sm:$0xff]  }
 0x11c   : > { %3378 = vtanh.f32 %v652_v53  ;;  %v902_v61 = vpop.f32.mrf.mxu1  ;;  %v2805_v62 = vmul.f32 -1.442695, %v918_v59  ;;  %v4020_v51 = vld [vmem:[%s4351_s2 + $0x18] ss:$12 sps:$4 sm:$0xff]   ;;  %v3308_v52 = vld [vmem:[%s4351_s2 + $0x20] ss:$12 sps:$4 sm:$0xff]  }
 0x11d   : > { %3380 = vpow2.f32 %v2804_v54  ;;  %v4030_v53 = vld [vmem:[%s4351_s2 + $0x4] ss:$12 sps:$4 sm:$0xff]   ;;  %v4036_v54 = vld [vmem:[%s4351_s2] ss:$12 sps:$4 sm:$0xff]   ;;  %v3312_v55 = vld [vmem:[%s4351_s2 + $0x8] ss:$12 sps:$4 sm:$0xff]  }
 0x11e   : > { %v3075_v63 = vpop.f32.mrf.mxu1  ;;  %3382 = vpow2.f32 %v2805_v62  ;;  %v4047_v56 = vld [vmem:[%s4352_s3 + $0xac] ss:$12 sps:$4 sm:$0xff]   ;;  %v941_v57 = vld [vmem:[%s3528_s21] sm:$0xc] }
 0x129   : > { %v3379_v10 = vpop.eup %3378 }
 0x12a   : > { %v3381_v11 = vpop.eup %3380  ;;  %v655_v12 = vmul.f32 %v3379_v10, %v654_v9 }
 0x12b   : > { %v912_v14 = vadd.f32 1.0, %v3381_v11  ;;  %v3383_v20 = vpop.eup %3382 }
 0x12c   : > { %v3875_v15 = vadd.f32 %v656_v13, %v655_v12  ;;  %v942_v12 = vld [vmem:[%s3528_s21 + $0x8] sm:$0xc] }
 0x12d   : > { %3384 = vrcp.f32 %v912_v14 }
 0x12e   : > { %v658_v17 = vpack.c.bf16 %v3875_v15, %v3875_v15 }
 0x130   : > { %659 = vst [vmem:[%s3523_s18] sm:$0x1] %v658_v17  ;;  %1137 = vmatmul.mubr.bf16.vlgmr.msra.gmra.mxu0 %v658_v17  ;;  %3093 = vmatmul.mubr.bf16.vlgmr.msra.gmra.mxu1 %v658_v17 }
 0x131   : > { %1388 = vmatpush1.bf16.msra.mxu0 %v3674_v28  ;;  %3097 = vmatpush3.bf16.msra.mxu1 %v3282_v16  ;;  %v3284_v28 = vld [vmem:[%s4352_s3 + $0x80] ss:$12 sps:$4 sm:$0xff]  }
 0x132   : > { %1389 = vmatprep.subr.bf16.mxu0 %v3680_v29  ;;  %3098 = vmatprep.subr.bf16.mxu1 %v3459_v3  ;;  %v922_v29 = vadd.f32 1.0, %v3383_v20 }
 0x133   : > { %1419 = vmatprep.mubr.bf16.mxu0 %v3460_v4  ;;  %3112 = vmatprep.mubr.msk.bf16.mxu1 %vm3461_vm0, %v3459_v3 }
 0x134   : > { %3386 = vrcp.f32 %v922_v29 }
 0x135   : > { %1390 = vmatpush1.bf16.msra.mxu0 %v3690_v31  ;;  %3099 = vmatpush3.bf16.msra.mxu1 %v3283_v24  ;;  %v662_v31 = vld [vmem:[%s3533_s25 + $0x10] sm:$0xc0] }
 0x136   : > { %1391 = vmatprep.subr.bf16.mxu0 %v3696_v32  ;;  %3100 = vmatprep.subr.bf16.mxu1 %v3459_v3 }
 0x139   : > { %1392 = vmatpush1.bf16.msra.mxu0 %v3706_v34  ;;  %3101 = vmatpush3.bf16.msra.mxu1 %v3284_v28  ;;  %v3286_v34 = vld [vmem:[%s4352_s3 + $0x50] ss:$12 sps:$4 sm:$0xff]  }
 0x13a   : > { %v3385_v23 = vpop.eup %3384  ;;  %1393 = vmatprep.subr.bf16.mxu0 %v3712_v35  ;;  %3102 = vmatprep.subr.bf16.mxu1 %v3459_v3  ;;  %v3287_v35 = vld [vmem:[%s4352_s3 + $0x38] ss:$12 sps:$4 sm:$0xff]  }
 0x13b   : > { %v929_v26 = vmul.f32 %v3385_v23, %v927_v21  ;;  %v943_v23 = vld [vmem:[%s3528_s21 + $0x10] sm:$0xc] }
 0x13d   : > { %v930_v32 = vadd.f32 %v929_v26, %v662_v31  ;;  %1394 = vmatpush1.bf16.msra.mxu0 %v3722_v37  ;;  %3103 = vmatpush3.bf16.msra.mxu1 %v3285_v22  ;;  %v3288_v37 = vld [vmem:[%s4352_s3 + $0x20] ss:$12 sps:$4 sm:$0xff]   ;;  %v1221_v26 = vld [vmem:[%s3533_s25] sm:$0x30] }
 0x13e   : > { %1395 = vmatprep.subr.bf16.mxu0 %v3728_v38  ;;  %3104 = vmatprep.subr.bf16.mxu1 %v3459_v3 }
 0x13f   : > { %3388 = vtanh.f32 %v930_v32 }
 0x141   : > { %1396 = vmatpush1.bf16.msra.mxu0 %v3738_v40  ;;  %3105 = vmatpush3.bf16.msra.mxu1 %v3286_v34  ;;  %v3387_v38 = vpop.eup %3386  ;;  %v935_v40 = vrot.slane %v3790_v50, 2 }
 0x142   : > { %1397 = vmatprep.subr.bf16.mxu0 %v3746_v41  ;;  %3106 = vmatprep.subr.bf16.mxu1 %v3459_v3  ;;  %v3289_v41 = vld [vmem:[%s4352_s3 + $0x8] ss:$12 sps:$4 sm:$0xff]  }
 0x143   : > { %v937_v30 = vmul.f32 %v3387_v38, %v935_v40 }
 0x145   : > { %1398 = vmatpush1.bf16.msra.mxu0 %v3756_v43  ;;  %3107 = vmatpush3.bf16.msra.mxu1 %v3287_v35  ;;  %v932_v43 = vsub.f32 1.0, %v3387_v38 }
 0x146   : > { %1399 = vmatprep.subr.bf16.mxu0 %v3762_v44  ;;  %3108 = vmatprep.subr.bf16.mxu1 %v3459_v3 }
 0x149   : > { %1400 = vmatpush1.bf16.msra.mxu0 %v3772_v46  ;;  %3109 = vmatpush3.bf16.msra.mxu1 %v3288_v37 }
 0x14a   : > { %1401 = vmatprep.subr.bf16.mxu0 %v3778_v47  ;;  %3110 = vmatprep.subr.bf16.mxu1 %v3459_v3 }
 0x14c   : > { %v3389_v27 = vpop.eup %3388 }
 0x14d   : > { %1402 = vmatpush1.bf16.msra.mxu0 %v3788_v49  ;;  %3111 = vmatpush3.bf16.msra.mxu1 %v3289_v41  ;;  %v933_v44 = vmul.f32 %v3389_v27, %v932_v43  ;;  %v3982_v49 = vld [vmem:[%s4351_s2 + $0x4c] ss:$12 sps:$4 sm:$0xff]  }
 0x14e   : > { %1670 = vmatprep.subr.bf16.mxu0 %v3543_v1  ;;  %3116 = vmatprep.subr.bf16.mxu1 %v3459_v3  ;;  %v3290_v1 = vld [vmem:[%s4351_s2 + $0xb0] ss:$12 sps:$4 sm:$0xff]  }
 0x14f   : > { %v3939_v46 = vadd.f32 %v937_v30, %v933_v44 }
 0x151   : > { %v939_v50 = vpack.c.bf16 %v3939_v46, %v3939_v46 }
 0x153   : > { %940 = vst [vmem:[%s3538_s28] sm:$0x8] %v939_v50  ;;  %v1257_v47 = vrot.slane %v939_v50, 3  ;;  %v1222_v50 = vld [vmem:[%s3533_s25 + $0x8] sm:$0x30] }
 0x155   : > { %1420 = vmatmul.mubr.bf16.vlgmr.msra.gmra.mxu0 %v1257_v47  ;;  %3113 = vmatmul.mubr.bf16.vlgmr.msra.gmra.mxu1 %v1257_v47 }
 0x156   : > { %1671 = vmatpush1.bf16.msra.mxu0 %v3548_v2  ;;  %1702 = vmatprep.mubr.bf16.mxu0 %v3460_v4  ;;  %v3291_v2 = vld [vmem:[%s4351_s2 + $0x98] ss:$12 sps:$4 sm:$0xff]  }
 0x157   : > { %1672 = vmatprep.subr.bf16.mxu0 %v3556_v5  ;;  %3132 = vmatprep.mubr.msk.bf16.mxu1 %vm3461_vm0, %v3459_v3  ;;  %v3292_v5 = vld [vmem:[%s4351_s2 + $0x80] ss:$12 sps:$4 sm:$0xff]  }
 0x158   : > { %3117 = vmatpush3.bf16.msra.mxu1 %v3290_v1 }
 0x159   : > { %3118 = vmatprep.subr.bf16.mxu1 %v3459_v3 }
 0x15a   : > { %1673 = vmatpush1.bf16.msra.mxu0 %v3564_v6  ;;  %v3966_v6 = vld [vmem:[%s4351_s2 + $0x64] ss:$12 sps:$4 sm:$0xff]  }
 0x15b   : > { %1674 = vmatprep.subr.bf16.mxu0 %v3570_v7  ;;  %v3972_v7 = vld [vmem:[%s4351_s2 + $0x60] ss:$12 sps:$4 sm:$0xff]  }
 0x15c   : > { %3119 = vmatpush3.bf16.msra.mxu1 %v3291_v2 }
 0x15d   : > { %3120 = vmatprep.subr.bf16.mxu1 %v3459_v3 }
 0x15e   : > { %1675 = vmatpush1.bf16.msra.mxu0 %v3576_v8  ;;  %v3296_v8 = vld [vmem:[%s4351_s2 + $0x68] ss:$12 sps:$4 sm:$0xff]  }
 0x15f   : > { %1676 = vmatprep.subr.bf16.mxu0 %v3966_v6 }
 0x160   : > { %3121 = vmatpush3.bf16.msra.mxu1 %v3292_v5 }
 0x161   : > { %3122 = vmatprep.subr.bf16.mxu1 %v3459_v3 }
 0x162   : > { %1677 = vmatpush1.bf16.msra.mxu0 %v3972_v7 }
 0x163   : > { %1678 = vmatprep.subr.bf16.mxu0 %v3982_v49 }
 0x164   : > { %3123 = vmatpush3.bf16.msra.mxu1 %v3296_v8 }
 0x165   : > { %3124 = vmatprep.subr.bf16.mxu1 %v3459_v3 }
 0x166   : > { %1679 = vmatpush1.bf16.msra.mxu0 %v3988_v33 }
 0x167   : > { %1680 = vmatprep.subr.bf16.mxu0 %v3998_v39 }
 0x168   : > { %3125 = vmatpush3.bf16.msra.mxu1 %v3300_v36  ;;  %v1215_v36 = vrot.slane %v3875_v15, 6  ;;  %v3316_v15 = vld [vmem:[%s4352_s3 + $0xb0] ss:$12 sps:$4 sm:$0xff]  }
 0x169   : > { %3126 = vmatprep.subr.bf16.mxu1 %v3459_v3 }
 0x16a   : > { %1681 = vmatpush1.bf16.msra.mxu0 %v4004_v42 }
 0x16b   : > { %1682 = vmatprep.subr.bf16.mxu0 %v4014_v48 }
 0x16c   : > { %3127 = vmatpush3.bf16.msra.mxu1 %v3304_v45 }
 0x16d   : > { %3128 = vmatprep.subr.bf16.mxu1 %v3459_v3 }
 0x16e   : > { %1683 = vmatpush1.bf16.msra.mxu0 %v4020_v51 }
 0x16f   : > { %1684 = vmatprep.subr.bf16.mxu0 %v4030_v53 }
 0x170   : > { %3129 = vmatpush3.bf16.msra.mxu1 %v3308_v52 }
 0x171   : > { %3130 = vmatprep.subr.bf16.mxu1 %v3459_v3 }
 0x172   : > { %1685 = vmatpush1.bf16.msra.mxu0 %v4036_v54 }
 0x173   : > { %1953 = vmatprep.subr.bf16.mxu0 %v4047_v56 }
 0x174   : > { %3131 = vmatpush3.bf16.msra.mxu1 %v3312_v55 }
 0x175   : > { %3136 = vmatprep.subr.bf16.mxu1 %v3459_v3 }
 0x1f0   : > { %v1138_v58 = vpop.f32.mrf.mxu0  ;;  %v1179_v59 = vpop.f32.mrf.mxu1 }
 0x1f1   : > { %v1186_v60 = vrot.slane %v1138_v58, 6  ;;  %v1205_v28 = vadd.f32 %v3868_v25, %v1179_v59 }
 0x1f2   : > { %v1140_v61 = vpop.f32.mrf.mxu0  ;;  %v3094_v62 = vpop.f32.mrf.mxu1 }
 0x1f3   : > { %v1188_v63 = vadd.f32 %v1186_v60, %v941_v57  ;;  %v1196_v11 = vrot.slane %v1140_v61, 6  ;;  %v1207_v21 = vrot.slane %v1205_v28, 6  ;;  %v4064_v62 = vld [vmem:[%s4352_s3 + $0xa8] ss:$12 sps:$4 sm:$0xff]  }
 0x1f4   : > { %v1142_v0 = vpop.f32.mrf.mxu0  ;;  %v1182_v9 = vpop.f32.mrf.mxu1  ;;  %v3328_v28 = vld [vmem:[%s4352_s3 + $0x68] ss:$12 sps:$4 sm:$0xff]  }
 0x1f5   : > { %v2830_v10 = vmul.f32 -1.442695, %v1188_v63  ;;  %v1198_v16 = vadd.f32 %v1196_v11, %v942_v12  ;;  %v4073_v0 = vld [vmem:[%s4352_s3 + $0x94] ss:$12 sps:$4 sm:$0xff]   ;;  %v4079_v9 = vld [vmem:[%s4352_s3 + $0x90] ss:$12 sps:$4 sm:$0xff]  }
 0x1f6   : > { %v1143_v13 = vpop.f32.mrf.mxu0  ;;  %v3095_v14 = vpop.f32.mrf.mxu1  ;;  %v4089_v11 = vld [vmem:[%s4352_s3 + $0x7c] ss:$12 sps:$4 sm:$0xff]  }
 0x1f7   : > { %3390 = vpow2.f32 %v2830_v10  ;;  %v2831_v17 = vmul.f32 -1.442695, %v1198_v16  ;;  %v3320_v10 = vld [vmem:[%s4352_s3 + $0x98] ss:$12 sps:$4 sm:$0xff]   ;;  %v3324_v16 = vld [vmem:[%s4352_s3 + $0x80] ss:$12 sps:$4 sm:$0xff]  }
 0x1f8   : > { %v4099_v14 = vld [vmem:[%s4352_s3 + $0x78] ss:$12 sps:$4 sm:$0xff]  }
 0x1f9   : > { %3392 = vpow2.f32 %v2831_v17  ;;  %v4109_v17 = vld [vmem:[%s4352_s3 + $0x64] ss:$12 sps:$4 sm:$0xff]  }
 0x204   : > { %v3391_v24 = vpop.eup %3390 }
 0x205   : > { %v1192_v19 = vadd.f32 1.0, %v3391_v24 }
 0x206   : > { %v3393_v20 = vpop.eup %3392 }
 0x207   : > { %3394 = vrcp.f32 %v1192_v19  ;;  %v1202_v29 = vadd.f32 1.0, %v3393_v20  ;;  %v4115_v20 = vld [vmem:[%s4352_s3 + $0x60] ss:$12 sps:$4 sm:$0xff]  }
 0x209   : > { %3396 = vrcp.f32 %v1202_v29 }
 0x214   : > { %v3395_v22 = vpop.eup %3394 }
 0x215   : > { %v1209_v31 = vmul.f32 %v3395_v22, %v1207_v21  ;;  %v1421_v32 = vpop.f32.mrf.mxu0  ;;  %v1462_v34 = vpop.f32.mrf.mxu1  ;;  %v1223_v21 = vld [vmem:[%s3533_s25 + $0x10] sm:$0x30]  ;;  %v4126_v22 = vld [vmem:[%s4352_s3 + $0x4c] ss:$12 sps:$4 sm:$0xff]  }
 0x216   : > { %v1469_v35 = vrot.slane %v1421_v32, 4  ;;  %v3397_v5 = vpop.eup %3396  ;;  %v1488_v13 = vadd.f32 %v3885_v18, %v1462_v34  ;;  %v3332_v32 = vld [vmem:[%s4352_s3 + $0x50] ss:$12 sps:$4 sm:$0xff]   ;;  %v4142_v34 = vld [vmem:[%s4352_s3 + $0x34] ss:$12 sps:$4 sm:$0xff]  }
 0x217   : > { %v1210_v37 = vadd.f32 %v1209_v31, %v943_v23  ;;  %v1423_v38 = vpop.f32.mrf.mxu0  ;;  %v3114_v40 = vpop.f32.mrf.mxu1  ;;  %v1212_v45 = vsub.f32 1.0, %v3397_v5  ;;  %v1217_v57 = vmul.f32 %v3397_v5, %v1215_v36 }
 0x218   : > { %v1471_v41 = vadd.f32 %v1469_v35, %v1221_v26  ;;  %v1479_v30 = vrot.slane %v1423_v38, 4  ;;  %v1490_v19 = vrot.slane %v1488_v13, 4  ;;  %v4132_v26 = vld [vmem:[%s4352_s3 + $0x48] ss:$12 sps:$4 sm:$0xff]   ;;  %v4148_v35 = vld [vmem:[%s4352_s3 + $0x30] ss:$12 sps:$4 sm:$0xff]  }
 0x219   : > { %3398 = vtanh.f32 %v1210_v37  ;;  %v1425_v43 = vpop.f32.mrf.mxu0  ;;  %v1465_v27 = vpop.f32.mrf.mxu1  ;;  %v3336_v37 = vld [vmem:[%s4352_s3 + $0x38] ss:$12 sps:$4 sm:$0xff]   ;;  %v4158_v38 = vld [vmem:[%s4352_s3 + $0x1c] ss:$12 sps:$4 sm:$0xff]  }
 0x21a   : > { %v2856_v44 = vmul.f32 -1.442695, %v1471_v41  ;;  %v1481_v2 = vadd.f32 %v1479_v30, %v1222_v50  ;;  %v4164_v40 = vld [vmem:[%s4352_s3 + $0x18] ss:$12 sps:$4 sm:$0xff]   ;;  %v3340_v41 = vld [vmem:[%s4352_s3 + $0x20] ss:$12 sps:$4 sm:$0xff]  }
 0x21b   : > { %v1426_v47 = vpop.f32.mrf.mxu0  ;;  %v3115_v1 = vpop.f32.mrf.mxu1  ;;  %v4174_v43 = vld [vmem:[%s4352_s3 + $0x4] ss:$12 sps:$4 sm:$0xff]   ;;  %v3344_v30 = vld [vmem:[%s4352_s3 + $0x8] ss:$12 sps:$4 sm:$0xff]   ;;  %v1498_v50 = vrot.slane %v3939_v46, 2 }
 0x21c   : > { %3400 = vpow2.f32 %v2856_v44  ;;  %v2857_v8 = vmul.f32 -1.442695, %v1481_v2  ;;  %v4180_v44 = vld [vmem:[%s4352_s3] ss:$12 sps:$4 sm:$0xff]  }
 0x21d   : > { %v3347_v46 = vld [vmem:[%s4351_s2 + $0xac] ss:$12 sps:$4 sm:$0xff]  }
 0x21e   : > { %3402 = vpow2.f32 %v2857_v8 }
 0x226   : > { %v3399_v52 = vpop.eup %3398 }
 0x227   : > { %v1213_v55 = vmul.f32 %v3399_v52, %v1212_v45  ;;  %v3345_v52 = vld [vmem:[%s4351_s2 + $0xa8] ss:$12 sps:$4 sm:$0xff]  }
 0x229   : > { %v3401_v58 = vpop.eup %3400  ;;  %v4057_v59 = vadd.f32 %v1217_v57, %v1213_v55  ;;  %v3348_v55 = vld [vmem:[%s4351_s2 + $0xb0] ss:$12 sps:$4 sm:$0xff]   ;;  %v3351_v57 = vld [vmem:[%s4351_s2 + $0x94] ss:$12 sps:$4 sm:$0xff]  }
 0x22a   : > { %v1475_v60 = vadd.f32 1.0, %v3401_v58  ;;  %v3349_v58 = vld [vmem:[%s4351_s2 + $0x90] ss:$12 sps:$4 sm:$0xff]  }
 0x22b   : > { %v1219_v61 = vpack.c.bf16 %v4057_v59, %v4057_v59  ;;  %v3403_v12 = vpop.eup %3402 }
 0x22c   : > { %3404 = vrcp.f32 %v1475_v60  ;;  %v1485_v24 = vadd.f32 1.0, %v3403_v12  ;;  %v3352_v60 = vld [vmem:[%s4351_s2 + $0x98] ss:$12 sps:$4 sm:$0xff]   ;;  %v3358_v12 = vld [vmem:[%s4351_s2 + $0x50] ss:$12 sps:$4 sm:$0xff]  }
 0x22d   : > { %1220 = vst [vmem:[%s3523_s18] sm:$0x2] %v1219_v61  ;;  %v1540_v63 = vrot.slane %v1219_v61, 1  ;;  %v3355_v61 = vld [vmem:[%s4351_s2 + $0x7c] ss:$12 sps:$4 sm:$0xff]  }
 0x22e   : > { %3406 = vrcp.f32 %v1485_v24 }
 0x22f   : > { %1703 = vmatmul.mubr.bf16.vlgmr.msra.gmra.mxu0 %v1540_v63  ;;  %3133 = vmatmul.mubr.bf16.vlgmr.msra.gmra.mxu1 %v1540_v63  ;;  %v3356_v63 = vld [vmem:[%s4351_s2 + $0x80] ss:$12 sps:$4 sm:$0xff]  }
 0x230   : > { %1954 = vmatpush1.bf16.msra.mxu0 %v4064_v62  ;;  %3137 = vmatpush3.bf16.msra.mxu1 %v3316_v15  ;;  %v3353_v15 = vld [vmem:[%s4351_s2 + $0x78] ss:$12 sps:$4 sm:$0xff]  }
 0x231   : > { %1955 = vmatprep.subr.bf16.mxu0 %v4073_v0  ;;  %3138 = vmatprep.subr.bf16.mxu1 %v3459_v3 }
 0x232   : > { %1985 = vmatprep.mubr.bf16.mxu0 %v3460_v4  ;;  %3152 = vmatprep.mubr.msk.bf16.mxu1 %vm3461_vm0, %v3459_v3 }
 0x234   : > { %1956 = vmatpush1.bf16.msra.mxu0 %v4079_v9  ;;  %3139 = vmatpush3.bf16.msra.mxu1 %v3320_v10  ;;  %v3357_v10 = vld [vmem:[%s4351_s2 + $0x68] ss:$12 sps:$4 sm:$0xff]  }
 0x235   : > { %1957 = vmatprep.subr.bf16.mxu0 %v4089_v11  ;;  %3140 = vmatprep.subr.bf16.mxu1 %v3459_v3 }
 0x238   : > { %1958 = vmatpush1.bf16.msra.mxu0 %v4099_v14  ;;  %3141 = vmatpush3.bf16.msra.mxu1 %v3324_v16 }
 0x239   : > { %v3405_v29 = vpop.eup %3404  ;;  %1959 = vmatprep.subr.bf16.mxu0 %v4109_v17  ;;  %3142 = vmatprep.subr.bf16.mxu1 %v3459_v3 }
 0x23a   : > { %v1492_v23 = vmul.f32 %v3405_v29, %v1490_v19  ;;  %v1505_v29 = vld [vmem:[%s3528_s21 + $0x8] sm:$0x30] }
 0x23b   : > { %v3407_v27 = vpop.eup %3406 }
 0x23c   : > { %v1493_v31 = vadd.f32 %v1492_v23, %v1223_v21  ;;  %1960 = vmatpush1.bf16.msra.mxu0 %v4115_v20  ;;  %3143 = vmatpush3.bf16.msra.mxu1 %v3328_v28  ;;  %v1495_v47 = vsub.f32 1.0, %v3407_v27  ;;  %v1500_v5 = vmul.f32 %v3407_v27, %v1498_v50 }
 0x23d   : > { %1961 = vmatprep.subr.bf16.mxu0 %v4126_v22  ;;  %3144 = vmatprep.subr.bf16.mxu1 %v3459_v3 }
 0x23e   : > { %3408 = vtanh.f32 %v1493_v31 }
 0x240   : > { %1962 = vmatpush1.bf16.msra.mxu0 %v4132_v26  ;;  %3145 = vmatpush3.bf16.msra.mxu1 %v3332_v32 }
 0x241   : > { %1963 = vmatprep.subr.bf16.mxu0 %v4142_v34  ;;  %3146 = vmatprep.subr.bf16.mxu1 %v3459_v3 }
 0x244   : > { %1964 = vmatpush1.bf16.msra.mxu0 %v4148_v35  ;;  %3147 = vmatpush3.bf16.msra.mxu1 %v3336_v37 }
 0x245   : > { %1965 = vmatprep.subr.bf16.mxu0 %v4158_v38  ;;  %3148 = vmatprep.subr.bf16.mxu1 %v3459_v3 }
 0x248   : > { %1966 = vmatpush1.bf16.msra.mxu0 %v4164_v40  ;;  %3149 = vmatpush3.bf16.msra.mxu1 %v3340_v41 }
 0x249   : > { %1967 = vmatprep.subr.bf16.mxu0 %v4174_v43  ;;  %3150 = vmatprep.subr.bf16.mxu1 %v3459_v3 }
 0x24b   : > { %v3409_v1 = vpop.eup %3408 }
 0x24c   : > { %1968 = vmatpush1.bf16.msra.mxu0 %v4180_v44  ;;  %3151 = vmatpush3.bf16.msra.mxu1 %v3344_v30  ;;  %v1496_v2 = vmul.f32 %v3409_v1, %v1495_v47  ;;  %v1506_v47 = vld [vmem:[%s3528_s21 + $0x10] sm:$0x30] }
 0x24d   : > { %3156 = vmatprep.subr.bf16.mxu1 %v3459_v3  ;;  %2236 = vmatprep.subr.bf16.mxu0 %v3347_v46 }
 0x24e   : > { %v4190_v8 = vadd.f32 %v1500_v5, %v1496_v2  ;;  %v1787_v2 = vld [vmem:[%s3533_s25] sm:$0xc] }
 0x250   : > { %v1502_v36 = vpack.c.bf16 %v4190_v8, %v4190_v8 }
 0x252   : > { %1503 = vst [vmem:[%s3538_s28] sm:$0x4] %v1502_v36  ;;  %v1823_v45 = vrot.slane %v1502_v36, 2 }
 0x254   : > { %1986 = vmatmul.mubr.bf16.vlgmr.msra.gmra.mxu0 %v1823_v45  ;;  %3153 = vmatmul.mubr.bf16.vlgmr.msra.gmra.mxu1 %v1823_v45 }
 0x255   : > { %2268 = vmatprep.mubr.bf16.mxu0 %v3460_v4  ;;  %3172 = vmatprep.mubr.msk.bf16.mxu1 %vm3461_vm0, %v3459_v3 }
 0x256   : > { %2237 = vmatpush1.bf16.msra.mxu0 %v3345_v52  ;;  %3157 = vmatpush3.bf16.msra.mxu1 %v3348_v55 }
 0x257   : > { %3158 = vmatprep.subr.bf16.mxu1 %v3459_v3  ;;  %2238 = vmatprep.subr.bf16.mxu0 %v3351_v57 }
 0x25a   : > { %2239 = vmatpush1.bf16.msra.mxu0 %v3349_v58  ;;  %3159 = vmatpush3.bf16.msra.mxu1 %v3352_v60 }
 0x25b   : > { %3160 = vmatprep.subr.bf16.mxu1 %v3459_v3  ;;  %2240 = vmatprep.subr.bf16.mxu0 %v3355_v61 }
 0x25e   : > { %2241 = vmatpush1.bf16.msra.mxu0 %v3353_v15  ;;  %3161 = vmatpush3.bf16.msra.mxu1 %v3356_v63  ;;  %v1788_v63 = vld [vmem:[%s3533_s25 + $0x8] sm:$0xc] }
 0x25f   : > { %2242 = vmatprep.subr.bf16.mxu0 %v3966_v6  ;;  %3162 = vmatprep.subr.bf16.mxu1 %v3459_v3  ;;  %v3359_v6 = vld [vmem:[%s4351_s2 + $0x38] ss:$12 sps:$4 sm:$0xff]  }
 0x262   : > { %2243 = vmatpush1.bf16.msra.mxu0 %v3972_v7  ;;  %3163 = vmatpush3.bf16.msra.mxu1 %v3357_v10  ;;  %v3360_v7 = vld [vmem:[%s4351_s2 + $0x20] ss:$12 sps:$4 sm:$0xff]  }
 0x263   : > { %2244 = vmatprep.subr.bf16.mxu0 %v3982_v49  ;;  %3164 = vmatprep.subr.bf16.mxu1 %v3459_v3  ;;  %v3361_v49 = vld [vmem:[%s4351_s2 + $0x8] ss:$12 sps:$4 sm:$0xff]  }
 0x266   : > { %2245 = vmatpush1.bf16.msra.mxu0 %v3988_v33  ;;  %3165 = vmatpush3.bf16.msra.mxu1 %v3358_v12  ;;  %v1504_v33 = vld [vmem:[%s3528_s21] sm:$0x30] }
 0x267   : > { %2246 = vmatprep.subr.bf16.mxu0 %v3998_v39  ;;  %3166 = vmatprep.subr.bf16.mxu1 %v3459_v3 }
 0x26a   : > { %2247 = vmatpush1.bf16.msra.mxu0 %v4004_v42  ;;  %3167 = vmatpush3.bf16.msra.mxu1 %v3359_v6 }
 0x26b   : > { %2248 = vmatprep.subr.bf16.mxu0 %v4014_v48  ;;  %3168 = vmatprep.subr.bf16.mxu1 %v3459_v3 }
 0x26e   : > { %2249 = vmatpush1.bf16.msra.mxu0 %v4020_v51  ;;  %3169 = vmatpush3.bf16.msra.mxu1 %v3360_v7 }
 0x26f   : > { %2250 = vmatprep.subr.bf16.mxu0 %v4030_v53  ;;  %3170 = vmatprep.subr.bf16.mxu1 %v3459_v3 }
 0x272   : > { %2251 = vmatpush1.bf16.msra.mxu0 %v4036_v54  ;;  %3171 = vmatpush3.bf16.msra.mxu1 %v3361_v49 }
 0x273   : > { %2519 = vmatprep.subr.bf16.mxu0 %v4047_v56  ;;  %3176 = vmatprep.subr.bf16.mxu1 %v3459_v3 }
 0x2ef   : > { %v1704_v39 = vpop.f32.mrf.mxu0  ;;  %v1745_v42 = vpop.f32.mrf.mxu1 }
 0x2f0   : > { %v1752_v48 = vrot.slane %v1704_v39, 4  ;;  %v1771_v41 = vadd.f32 %v3868_v25, %v1745_v42 }
 0x2f1   : > { %v1706_v51 = vpop.f32.mrf.mxu0  ;;  %v3134_v53 = vpop.f32.mrf.mxu1 }
 0x2f2   : > { %v1754_v13 = vadd.f32 %v1752_v48, %v1504_v33  ;;  %v1762_v28 = vrot.slane %v1706_v51, 4  ;;  %v1773_v30 = vrot.slane %v1771_v41, 4  ;;  %v1781_v33 = vrot.slane %v4057_v59, 6  ;;  %v3363_v59 = vld [vmem:[%s4352_s3 + $0x98] ss:$12 sps:$4 sm:$0xff]  }
 0x2f3   : > { %v1708_v16 = vpop.f32.mrf.mxu0  ;;  %v1748_v24 = vpop.f32.mrf.mxu1 }
 0x2f4   : > { %v2882_v19 = vmul.f32 -1.442695, %v1754_v13  ;;  %v1764_v56 = vadd.f32 %v1762_v28, %v1505_v29 }
 0x2f5   : > { %v1709_v21 = vpop.f32.mrf.mxu0  ;;  %v3135_v54 = vpop.f32.mrf.mxu1 }
 0x2f6   : > { %3410 = vpow2.f32 %v2882_v19  ;;  %v2883_v23 = vmul.f32 -1.442695, %v1764_v56  ;;  %v3362_v19 = vld [vmem:[%s4352_s3 + $0xb0] ss:$12 sps:$4 sm:$0xff]  }
 0x2f8   : > { %3412 = vpow2.f32 %v2883_v23 }
 0x303   : > { %v3411_v31 = vpop.eup %3410 }
 0x304   : > { %v1758_v32 = vadd.f32 1.0, %v3411_v31 }
 0x305   : > { %v3413_v37 = vpop.eup %3412 }
 0x306   : > { %3414 = vrcp.f32 %v1758_v32  ;;  %v1768_v27 = vadd.f32 1.0, %v3413_v37 }
 0x308   : > { %3416 = vrcp.f32 %v1768_v27 }
 0x313   : > { %v3415_v50 = vpop.eup %3414 }
 0x314   : > { %v1775_v1 = vmul.f32 %v3415_v50, %v1773_v30  ;;  %v1987_v5 = vpop.f32.mrf.mxu0  ;;  %v2028_v36 = vpop.f32.mrf.mxu1 }
 0x315   : > { %v2035_v45 = vrot.slane %v1987_v5, 6  ;;  %v3417_v7 = vpop.eup %3416  ;;  %v2054_v21 = vadd.f32 %v3885_v18, %v2028_v36  ;;  %v2071_v36 = vld [vmem:[%s3528_s21 + $0x8] sm:$0xc0] }
 0x316   : > { %v1776_v46 = vadd.f32 %v1775_v1, %v1506_v47  ;;  %v1989_v52 = vpop.f32.mrf.mxu0  ;;  %v3154_v55 = vpop.f32.mrf.mxu1  ;;  %v1778_v39 = vsub.f32 1.0, %v3417_v7  ;;  %v1783_v51 = vmul.f32 %v3417_v7, %v1781_v33 }
 0x317   : > { %v2037_v57 = vadd.f32 %v2035_v45, %v1787_v2  ;;  %v2045_v15 = vrot.slane %v1989_v52, 6  ;;  %v2056_v54 = vrot.slane %v2054_v21, 6 }
 0x318   : > { %3418 = vtanh.f32 %v1776_v46  ;;  %v1991_v58 = vpop.f32.mrf.mxu0  ;;  %v2031_v60 = vpop.f32.mrf.mxu1 }
 0x319   : > { %v2908_v61 = vmul.f32 -1.442695, %v2037_v57  ;;  %v2047_v6 = vadd.f32 %v2045_v15, %v1788_v63 }
 0x31a   : > { %v1992_v10 = vpop.f32.mrf.mxu0  ;;  %v3155_v12 = vpop.f32.mrf.mxu1 }
 0x31b   : > { %3420 = vpow2.f32 %v2908_v61  ;;  %v2909_v49 = vmul.f32 -1.442695, %v2047_v6  ;;  %v2353_v10 = vld [vmem:[%s3533_s25] sm:$0x3]  ;;  %v2072_v6 = vld [vmem:[%s3528_s21 + $0x10] sm:$0xc0] }
 0x31d   : > { %3422 = vpow2.f32 %v2909_v49 }
 0x325   : > { %v3419_v42 = vpop.eup %3418 }
 0x326   : > { %v1779_v48 = vmul.f32 %v3419_v42, %v1778_v39 }
 0x328   : > { %v3421_v53 = vpop.eup %3420  ;;  %v4266_v13 = vadd.f32 %v1783_v51, %v1779_v48 }
 0x329   : > { %v2041_v16 = vadd.f32 1.0, %v3421_v53 }
 0x32a   : > { %v1785_v24 = vpack.c.bf16 %v4266_v13, %v4266_v13  ;;  %v3423_v29 = vpop.eup %3422 }
 0x32b   : > { %3424 = vrcp.f32 %v2041_v16  ;;  %v2354_v16 = vld [vmem:[%s3533_s25 + $0x8] sm:$0x3] }
 0x32c   : > { %1786 = vst [vmem:[%s3523_s18] sm:$0x4] %v1785_v24  ;;  %v2106_v28 = vrot.slane %v1785_v24, 2 }
 0x32e   : > { %2269 = vmatmul.mubr.bf16.vlgmr.msra.gmra.mxu0 %v2106_v28  ;;  %3173 = vmatmul.mubr.bf16.vlgmr.msra.gmra.mxu1 %v2106_v28 }
 0x32f   : > { %2520 = vmatpush1.bf16.msra.mxu0 %v4064_v62  ;;  %3177 = vmatpush3.bf16.msra.mxu1 %v3362_v19  ;;  %v3364_v62 = vld [vmem:[%s4352_s3 + $0x80] ss:$12 sps:$4 sm:$0xff]  }
 0x330   : > { %2521 = vmatprep.subr.bf16.mxu0 %v4073_v0  ;;  %3178 = vmatprep.subr.bf16.mxu1 %v3459_v3  ;;  %v2051_v0 = vadd.f32 1.0, %v3423_v29 }
 0x331   : > { %2551 = vmatprep.mubr.bf16.mxu0 %v3460_v4  ;;  %3192 = vmatprep.mubr.msk.bf16.mxu1 %vm3461_vm0, %v3459_v3  ;;  %v3365_v4 = vld [vmem:[%s4352_s3 + $0x68] ss:$12 sps:$4 sm:$0xff]  }
 0x332   : > { %3426 = vrcp.f32 %v2051_v0 }
 0x333   : > { %2522 = vmatpush1.bf16.msra.mxu0 %v4079_v9  ;;  %3179 = vmatpush3.bf16.msra.mxu1 %v3363_v59  ;;  %v1789_v9 = vld [vmem:[%s3533_s25 + $0x10] sm:$0xc] }
 0x334   : > { %2523 = vmatprep.subr.bf16.mxu0 %v4089_v11  ;;  %3180 = vmatprep.subr.bf16.mxu1 %v3459_v3 }
 0x337   : > { %2524 = vmatpush1.bf16.msra.mxu0 %v4099_v14  ;;  %3181 = vmatpush3.bf16.msra.mxu1 %v3364_v62  ;;  %v3366_v14 = vld [vmem:[%s4352_s3 + $0x50] ss:$12 sps:$4 sm:$0xff]   ;;  %v2347_v62 = vrot.slane %v4266_v13, 6 }
 0x338   : > { %v3425_v56 = vpop.eup %3424  ;;  %2525 = vmatprep.subr.bf16.mxu0 %v4109_v17  ;;  %3182 = vmatprep.subr.bf16.mxu1 %v3459_v3  ;;  %v3367_v17 = vld [vmem:[%s4352_s3 + $0x38] ss:$12 sps:$4 sm:$0xff]  }
 0x339   : > { %v2058_v23 = vmul.f32 %v3425_v56, %v2056_v54 }
 0x33b   : > { %v2059_v11 = vadd.f32 %v2058_v23, %v1789_v9  ;;  %2526 = vmatpush1.bf16.msra.mxu0 %v4115_v20  ;;  %3183 = vmatpush3.bf16.msra.mxu1 %v3365_v4  ;;  %v3368_v20 = vld [vmem:[%s4352_s3 + $0x20] ss:$12 sps:$4 sm:$0xff]  }
 0x33c   : > { %2527 = vmatprep.subr.bf16.mxu0 %v4126_v22  ;;  %3184 = vmatprep.subr.bf16.mxu1 %v3459_v3 }
 0x33d   : > { %3428 = vtanh.f32 %v2059_v11 }
 0x33f   : > { %2528 = vmatpush1.bf16.msra.mxu0 %v4132_v26  ;;  %3185 = vmatpush3.bf16.msra.mxu1 %v3366_v14  ;;  %v3427_v22 = vpop.eup %3426  ;;  %v3369_v26 = vld [vmem:[%s4352_s3 + $0x8] ss:$12 sps:$4 sm:$0xff]  }
 0x340   : > { %2529 = vmatprep.subr.bf16.mxu0 %v4142_v34  ;;  %3186 = vmatprep.subr.bf16.mxu1 %v3459_v3  ;;  %v2064_v34 = vrot.slane %v4190_v8, 2 }
 0x342   : > { %v2066_v32 = vmul.f32 %v3427_v22, %v2064_v34 }
 0x343   : > { %2530 = vmatpush1.bf16.msra.mxu0 %v4148_v35  ;;  %3187 = vmatpush3.bf16.msra.mxu1 %v3367_v17  ;;  %v2061_v35 = vsub.f32 1.0, %v3427_v22 }
 0x344   : > { %2531 = vmatprep.subr.bf16.mxu0 %v4158_v38  ;;  %3188 = vmatprep.subr.bf16.mxu1 %v3459_v3 }
 0x347   : > { %2532 = vmatpush1.bf16.msra.mxu0 %v4164_v40  ;;  %3189 = vmatpush3.bf16.msra.mxu1 %v3368_v20 }
 0x348   : > { %2533 = vmatprep.subr.bf16.mxu0 %v4174_v43  ;;  %3190 = vmatprep.subr.bf16.mxu1 %v3459_v3  ;;  %v2070_v3 = vld [vmem:[%s3528_s21] sm:$0xc0] }
 0x34a   : > { %v3429_v38 = vpop.eup %3428 }
 0x34b   : > { %2534 = vmatpush1.bf16.msra.mxu0 %v4180_v44  ;;  %3191 = vmatpush3.bf16.msra.mxu1 %v3369_v26  ;;  %v2062_v31 = vmul.f32 %v3429_v38, %v2061_v35  ;;  %v2355_v26 = vld [vmem:[%s3533_s25 + $0x10] sm:$0x3] }
 0x34d   : > { %v4323_v40 = vadd.f32 %v2066_v32, %v2062_v31 }
 0x34f   : > { %v2068_v37 = vpack.c.bf16 %v4323_v40, %v4323_v40  ;;  %v2621_v31 = vrot.slane %v4323_v40, 2 }
 0x351   : > { %2069 = vst [vmem:[%s3538_s28] sm:$0x2] %v2068_v37  ;;  %v2389_v41 = vrot.slane %v2068_v37, 1 }
 0x353   : > { %2552 = vmatmul.mubr.bf16.vlgmr.msra.gmra.mxu0 %v2389_v41  ;;  %3193 = vmatmul.mubr.bf16.vlgmr.msra.gmra.mxu1 %v2389_v41 }
 0x3ee   : > { %v2270_v43 = vpop.f32.mrf.mxu0  ;;  %v2311_v8 = vpop.f32.mrf.mxu1 }
 0x3ef   : > { %v2318_v27 = vrot.slane %v2270_v43, 2  ;;  %v2337_v61 = vadd.f32 %v3868_v25, %v2311_v8 }
 0x3f0   : > { %v2272_v30 = vpop.f32.mrf.mxu0  ;;  %v3174_v50 = vpop.f32.mrf.mxu1 }
 0x3f1   : > { %v2320_v44 = vadd.f32 %v2318_v27, %v2070_v3  ;;  %v2328_v5 = vrot.slane %v2272_v30, 2  ;;  %v2339_v63 = vrot.slane %v2337_v61, 2 }
 0x3f2   : > { %v2274_v47 = vpop.f32.mrf.mxu0  ;;  %v2314_v1 = vpop.f32.mrf.mxu1 }
 0x3f3   : > { %v2934_v2 = vmul.f32 -1.442695, %v2320_v44  ;;  %v2330_v52 = vadd.f32 %v2328_v5, %v2071_v36 }
 0x3f4   : > { %v2275_v45 = vpop.f32.mrf.mxu0  ;;  %v3175_v46 = vpop.f32.mrf.mxu1 }
 0x3f5   : > { %3430 = vpow2.f32 %v2934_v2  ;;  %v2935_v55 = vmul.f32 -1.442695, %v2330_v52 }
 0x3f7   : > { %3432 = vpow2.f32 %v2935_v55 }
 0x402   : > { %v3431_v57 = vpop.eup %3430 }
 0x403   : > { %v2324_v58 = vadd.f32 1.0, %v3431_v57 }
 0x404   : > { %v3433_v60 = vpop.eup %3432 }
 0x405   : > { %3434 = vrcp.f32 %v2324_v58  ;;  %v2334_v15 = vadd.f32 1.0, %v3433_v60 }
 0x407   : > { %3436 = vrcp.f32 %v2334_v15 }
 0x412   : > { %v3435_v12 = vpop.eup %3434 }
 0x413   : > { %v2341_v7 = vmul.f32 %v3435_v12, %v2339_v63  ;;  %v2553_v49 = vpop.f32.mrf.mxu0  ;;  %v2594_v33 = vpop.f32.mrf.mxu1 }
 0x414   : > { %v2600_v39 = vadd.f32 %v2553_v49, %v2353_v10  ;;  %v3437_v21 = vpop.eup %3436  ;;  %v2614_v13 = vadd.f32 %v3885_v18, %v2594_v33 }
 0x415   : > { %v2342_v42 = vadd.f32 %v2341_v7, %v2072_v6  ;;  %v2555_v48 = vpop.f32.mrf.mxu0  ;;  %v3194_v51 = vpop.f32.mrf.mxu1  ;;  %v2344_v0 = vsub.f32 1.0, %v3437_v21  ;;  %v2349_v9 = vmul.f32 %v3437_v21, %v2347_v62 }
 0x416   : > { %v2960_v53 = vmul.f32 -1.442695, %v2600_v39  ;;  %v2607_v59 = vadd.f32 %v2555_v48, %v2354_v16 }
 0x417   : > { %3438 = vtanh.f32 %v2342_v42  ;;  %v2557_v24 = vpop.f32.mrf.mxu0  ;;  %v2597_v19 = vpop.f32.mrf.mxu1 }
 0x418   : > { %3440 = vpow2.f32 %v2960_v53  ;;  %v2961_v29 = vmul.f32 -1.442695, %v2607_v59 }
 0x419   : > { %v2558_v25 = vpop.f32.mrf.mxu0  ;;  %v3195_v28 = vpop.f32.mrf.mxu1 }
 0x41a   : > { %3442 = vpow2.f32 %v2961_v29 }
 0x424   : > { %v3439_v54 = vpop.eup %3438 }
 0x425   : > { %v3441_v4 = vpop.eup %3440  ;;  %v2345_v56 = vmul.f32 %v3439_v54, %v2344_v0 }
 0x426   : > { %v2604_v23 = vadd.f32 1.0, %v3441_v4 }
 0x427   : > { %v2350_v11 = vadd.f32 %v2349_v9, %v2345_v56  ;;  %v3443_v17 = vpop.eup %3442 }
 0x428   : > { %3444 = vrcp.f32 %v2604_v23  ;;  %v2611_v20 = vadd.f32 1.0, %v3443_v17 }
 0x429   : > { %v2351_v14 = vpack.c.bf16 %v2350_v11, %v2350_v11  ;;  %2627 = vst [vmem:[#allocation2 - $0x6] sm:$0xc0] %v2350_v11  ;;  %2629 = vst [vmem:[%s4357_s8 - $0x6] sm:$0xc0] %v2350_v11 }
 0x42a   : > { %3446 = vrcp.f32 %v2611_v20 }
 0x42b   : > { %2352 = vst [vmem:[%s3523_s18] sm:$0x8] %v2351_v14 }
 0x435   : > { %v3445_v22 = vpop.eup %3444 }
 0x436   : > { %v2615_v34 = vmul.f32 %v3445_v22, %v2614_v13 }
 0x437   : > { %v3447_v38 = vpop.eup %3446 }
 0x438   : > { %v2616_v35 = vadd.f32 %v2615_v34, %v2355_v26  ;;  %v2618_v32 = vsub.f32 1.0, %v3447_v38  ;;  %v2623_v3 = vmul.f32 %v3447_v38, %v2621_v31 }
 0x43a   : > { %3448 = vtanh.f32 %v2616_v35 }
 0x447   : > { %v3449_v37 = vpop.eup %3448 }
 0x448   : > { %v2619_v41 = vmul.f32 %v3449_v37, %v2618_v32 }
 0x44a   : > { %v2624_v43 = vadd.f32 %v2623_v3, %v2619_v41 }
 0x44c   : > { %v2625_v8 = vpack.c.bf16 %v2624_v43, %v2624_v43  ;;  %2628 = vst [vmem:[#allocation3] sm:$0x3] %v2624_v43  ;;  %2630 = vst [vmem:[%s4358_s9] sm:$0x3] %v2624_v43 }
 0x44e   : > { %2626 = vst [vmem:[%s3538_s28] sm:$0x1] %v2625_v8 }
 0x44f PF: > { %s20_s30 = sadd.s32 1, %s3456_s30  }
 0x450   : > { %p17_p6 = scmp.ge.s32.totalorder %s20_s30, 4  }
 0x452   :  { %19 = sbr.rel (!%p17_p6) target bundleno = 1 (0x1), region = 109 }

</bundles_post_ra>
